<compile_context>
chip_gen: v7x
topology: tpu7x:2x2x1
jax: 0.10.0
libtpu: 0.0.40
codegen_flags: <defaults>
</compile_context>

<pallas_src>
import math
import jax
import jax.numpy as jnp
from jax import lax
from jax.experimental import pallas as pl
from jax.experimental.pallas import tpu as pltpu

# ---- small synthetic BERT config --------------------------------------------
VOCAB = 100
MAX_POS = 32
TYPE_VOCAB = 2
HIDDEN = 32
NUM_HEADS = 2
HEAD_DIM = HIDDEN // NUM_HEADS
INTERMEDIATE = 64
NUM_LAYERS = 2
NUM_CLASSES = 2
SEQ = 8
BATCH = 2
LN_EPS = 1e-12
NEG_INF = -1e9


# ---- in-kernel helpers -------------------------------------------------------
def _layernorm(x, gamma, beta):
    mean = jnp.mean(x, axis=-1, keepdims=True)
    var = jnp.mean(jnp.square(x - mean), axis=-1, keepdims=True)
    inv = lax.rsqrt(var + LN_EPS)
    return (x - mean) * inv * gamma + beta


def _gelu(x):
    # TODO(synk): HF BERT uses exact erf-GELU; the tanh approximation is used
    # here (EUP-friendly on TPU) and matches to ~1e-3.
    c = math.sqrt(2.0 / math.pi)
    return 0.5 * x * (1.0 + jnp.tanh(c * (x + 0.044715 * x * x * x)))


# ---- fused Pallas kernel: whole forward for the whole batch ------------------
def _make_kernel(B, S):
    def bert_only_kernel(emb_ref, amask_ref, embg_ref, embb_ref,
                         wq_ref, bq_ref, wk_ref, bk_ref, wv_ref, bv_ref,
                         wo_ref, bo_ref, ln1g_ref, ln1b_ref,
                         w1_ref, b1_ref, w2_ref, b2_ref, ln2g_ref, ln2b_ref,
                         fcw_ref, fcb_ref, out_ref):
        # Embedding LayerNorm, fused into this kernel.  hidden: (B*S, H)
        hidden = _layernorm(emb_ref[...], embg_ref[...], embb_ref[...])
        # Block-diagonal additive mask over the flattened batch*seq axis:
        # -1e9 for cross-batch keys and for padded keys, 0 otherwise.
        add_mask = amask_ref[...]                               # (B*S, B*S)

        nt = (((1,), (1,)), ((), ()))   # contract last dims: q @ k^T without .T

        for l in range(NUM_LAYERS):     # static unroll; weights indexed statically
            x = hidden
            attn = bo_ref[l, :, :]      # (1, H), broadcasts over (B*S, H)
            for h in range(NUM_HEADS):
                # Per-head weights arrive pre-split from the wrapper -> no
                # in-kernel lane slicing at non-aligned offsets.
                qh = jnp.dot(x, wq_ref[l, h, :, :],
                             preferred_element_type=jnp.float32) + bq_ref[l, h, :, :]
                kh = jnp.dot(x, wk_ref[l, h, :, :],
                             preferred_element_type=jnp.float32) + bk_ref[l, h, :, :]
                vh = jnp.dot(x, wv_ref[l, h, :, :],
                             preferred_element_type=jnp.float32) + bv_ref[l, h, :, :]
                # (B*S, B*S) scores; 1/sqrt(HEAD_DIM) folded into wq/bq at prep.
                s = lax.dot_general(qh, kh, nt, preferred_element_type=jnp.float32)
                s = s + add_mask
                s = s - jnp.max(s, axis=-1, keepdims=True)
                p = jnp.exp(s)
                p = p * pl.reciprocal(jnp.sum(p, axis=-1, keepdims=True), approx=True)
                ctx = jnp.dot(p, vh, preferred_element_type=jnp.float32)      # (B*S, HD)
                attn = attn + jnp.dot(ctx, wo_ref[l, h, :, :],
                                      preferred_element_type=jnp.float32)     # (B*S, H)

            h1 = _layernorm(x + attn, ln1g_ref[l, :, :], ln1b_ref[l, :, :])
            ffn = _gelu(jnp.dot(h1, w1_ref[l, :, :],
                                preferred_element_type=jnp.float32) + b1_ref[l, :, :])
            ffn = jnp.dot(ffn, w2_ref[l, :, :],
                          preferred_element_type=jnp.float32) + b2_ref[l, :, :]
            hidden = _layernorm(h1 + ffn, ln2g_ref[l, :, :], ln2b_ref[l, :, :])

        # x.permute(0,2,1) + AdaptiveMaxPool1d(1)  ==  max over the sequence
        # axis, done per batch element on tile-aligned sublane slices.
        pooled = jnp.concatenate(
            [jnp.max(hidden[b * S:(b + 1) * S, :], axis=0, keepdims=True)
             for b in range(B)],
            axis=0)                                                           # (B, H)
        out_ref[...] = (jnp.dot(pooled, fcw_ref[...],
                                preferred_element_type=jnp.float32) + fcb_ref[...])

    return bert_only_kernel


# ---- Pallas wrapper ----------------------------------------------------------
def _rep0(shape):
    # Whole-array block, identical for every grid step.
    return pl.BlockSpec(shape, lambda i, _n=len(shape): (0,) * _n)


@jax.jit
def bert_only_forward(params, input_ids, attention_mask):
    B, S = input_ids.shape
    H, I, L, NH, HD = HIDDEN, INTERMEDIATE, NUM_LAYERS, NUM_HEADS, HEAD_DIM
    BS = B * S

    # Embedding gathers stay in plain JAX (glue); token_type_ids default to 0
    # as in the PyTorch module's forward (only input_ids / attention_mask).
    emb = (params["word_emb"][input_ids]
           + params["pos_emb"][None, :S, :]
           + params["type_emb"][0][None, None, :])                            # (B, S, H)
    emb = emb.reshape(BS, H)

    # Block-diagonal additive attention mask over the flattened (batch*seq)
    # axis: allowed iff same batch element AND key position not padded.
    key_mask = attention_mask.astype(jnp.float32)                             # (B, S)
    same_batch = jnp.eye(B, dtype=jnp.float32)                                # (B, B)
    allowed = jnp.broadcast_to(
        same_batch[:, None, :, None] * key_mask[None, None, :, :], (B, S, B, S))
    add_mask = ((1.0 - allowed) * NEG_INF).reshape(BS, BS)                    # (B*S, B*S)

    stk = params["stacked"]
    in_specs = [
        _rep0((BS, H)),                                      # embeddings (whole batch)
        _rep0((BS, BS)),                                     # additive mask
        _rep0((1, H)), _rep0((1, H)),                        # emb LN gamma/beta
        _rep0((L, NH, H, HD)), _rep0((L, NH, 1, HD)),        # wq, bq (scale folded in)
        _rep0((L, NH, H, HD)), _rep0((L, NH, 1, HD)),        # wk, bk
        _rep0((L, NH, H, HD)), _rep0((L, NH, 1, HD)),        # wv, bv
        _rep0((L, NH, HD, H)), _rep0((L, 1, H)),             # wo (per-head rows), bo
        _rep0((L, 1, H)), _rep0((L, 1, H)),                  # ln1 gamma/beta
        _rep0((L, H, I)), _rep0((L, 1, I)),                  # w1, b1
        _rep0((L, I, H)), _rep0((L, 1, H)),                  # w2, b2
        _rep0((L, 1, H)), _rep0((L, 1, H)),                  # ln2 gamma/beta
        _rep0((H, NUM_CLASSES)), _rep0((1, NUM_CLASSES)),    # fc weight / bias
    ]

    logits = pl.pallas_call(
        _make_kernel(B, S),
        out_shape=jax.ShapeDtypeStruct((B, NUM_CLASSES), jnp.float32),
        grid=(1,),
        in_specs=in_specs,
        out_specs=_rep0((B, NUM_CLASSES)),
        compiler_params=pltpu.CompilerParams(dimension_semantics=("arbitrary",)),
    )(emb, add_mask, params["emb_ln_g"], params["emb_ln_b"],
      stk["wq"], stk["bq"], stk["wk"], stk["bk"], stk["wv"], stk["bv"],
      stk["wo"], stk["bo"], stk["ln1_g"], stk["ln1_b"],
      stk["w1"], stk["b1"], stk["w2"], stk["b2"], stk["ln2_g"], stk["ln2_b"],
      params["fc_w"], params["fc_b"])
    return logits


# ---- parameter init (deterministic, synthetic) -------------------------------
def init_params(key):
    def normal(k, shape):
        return 0.02 * jax.random.normal(k, shape, dtype=jnp.float32)

    H, I, L, NH, HD = HIDDEN, INTERMEDIATE, NUM_LAYERS, NUM_HEADS, HEAD_DIM
    keys = jax.random.split(key, 4 + L)

    layers = []
    for li in range(L):
        lk = jax.random.split(keys[4 + li], 6)
        layers.append(dict(
            wq=normal(lk[0], (H, H)), bq=jnp.zeros((H,), jnp.float32),
            wk=normal(lk[1], (H, H)), bk=jnp.zeros((H,), jnp.float32),
            wv=normal(lk[2], (H, H)), bv=jnp.zeros((H,), jnp.float32),
            wo=normal(lk[3], (H, H)), bo=jnp.zeros((H,), jnp.float32),
            ln1_g=jnp.ones((H,), jnp.float32), ln1_b=jnp.zeros((H,), jnp.float32),
            w1=normal(lk[4], (H, I)), b1=jnp.zeros((I,), jnp.float32),
            w2=normal(lk[5], (I, H)), b2=jnp.zeros((H,), jnp.float32),
            ln2_g=jnp.ones((H,), jnp.float32), ln2_b=jnp.zeros((H,), jnp.float32),
        ))

    def stack(name):
        return jnp.stack([lyr[name] for lyr in layers], axis=0)   # leading layer axis

    scale = 1.0 / math.sqrt(HD)
    # Stack per-layer weights and pre-split per head so the kernel indexes
    # leading (layer, head) axes statically instead of lane-slicing. Softmax
    # scale is folded into Wq / bq here, once.
    stacked = {
        "wq": stack("wq").reshape(L, H, NH, HD).transpose(0, 2, 1, 3) * scale,
        "bq": stack("bq").reshape(L, NH, 1, HD) * scale,
        "wk": stack("wk").reshape(L, H, NH, HD).transpose(0, 2, 1, 3),
        "bk": stack("bk").reshape(L, NH, 1, HD),
        "wv": stack("wv").reshape(L, H, NH, HD).transpose(0, 2, 1, 3),
        "bv": stack("bv").reshape(L, NH, 1, HD),
        "wo": stack("wo").reshape(L, NH, HD, H),
        "bo": stack("bo")[:, None, :],
        "ln1_g": stack("ln1_g")[:, None, :], "ln1_b": stack("ln1_b")[:, None, :],
        "w1": stack("w1"), "b1": stack("b1")[:, None, :],
        "w2": stack("w2"), "b2": stack("b2")[:, None, :],
        "ln2_g": stack("ln2_g")[:, None, :], "ln2_b": stack("ln2_b")[:, None, :],
    }

    return {
        "word_emb": normal(keys[0], (VOCAB, HIDDEN)),
        "pos_emb": normal(keys[1], (MAX_POS, HIDDEN)),
        "type_emb": normal(keys[2], (TYPE_VOCAB, HIDDEN)),
        "emb_ln_g": jnp.ones((1, HIDDEN), jnp.float32),
        "emb_ln_b": jnp.zeros((1, HIDDEN), jnp.float32),
        "stacked": stacked,
        "fc_w": normal(keys[3], (HIDDEN, NUM_CLASSES)),
        "fc_b": jnp.zeros((1, NUM_CLASSES), jnp.float32),
    }


if __name__ == "__main__":
    key = jax.random.PRNGKey(0)
    pkey, idkey = jax.random.split(key)
    params = init_params(pkey)

    input_ids = jax.random.randint(idkey, (BATCH, SEQ), 0, VOCAB, dtype=jnp.int32)
    attention_mask = jnp.ones((BATCH, SEQ), jnp.int32)
    attention_mask = attention_mask.at[1, SEQ - 2:].set(0)   # pad tail of example 1

    logits = bert_only_forward(params, input_ids, attention_mask)
    logits = jax.block_until_ready(logits)

    assert logits.shape == (BATCH, NUM_CLASSES)
    assert bool(jnp.all(jnp.isfinite(logits)))
    print("KERNEL_OK")
</pallas_src>

<mosaic_0001>
module attributes {stable_mosaic.version = 11 : i64} {
  func.func @bert_only_kernel(%arg0: i32, %arg1: memref<16x32xf32, #tpu.memory_space<vmem>>, %arg2: memref<16x16xf32, #tpu.memory_space<vmem>>, %arg3: memref<1x32xf32, #tpu.memory_space<vmem>>, %arg4: memref<1x32xf32, #tpu.memory_space<vmem>>, %arg5: memref<2x2x32x16xf32, #tpu.memory_space<vmem>>, %arg6: memref<2x2x1x16xf32, #tpu.memory_space<vmem>>, %arg7: memref<2x2x32x16xf32, #tpu.memory_space<vmem>>, %arg8: memref<2x2x1x16xf32, #tpu.memory_space<vmem>>, %arg9: memref<2x2x32x16xf32, #tpu.memory_space<vmem>>, %arg10: memref<2x2x1x16xf32, #tpu.memory_space<vmem>>, %arg11: memref<2x2x16x32xf32, #tpu.memory_space<vmem>>, %arg12: memref<2x1x32xf32, #tpu.memory_space<vmem>>, %arg13: memref<2x1x32xf32, #tpu.memory_space<vmem>>, %arg14: memref<2x1x32xf32, #tpu.memory_space<vmem>>, %arg15: memref<2x32x64xf32, #tpu.memory_space<vmem>>, %arg16: memref<2x1x64xf32, #tpu.memory_space<vmem>>, %arg17: memref<2x64x32xf32, #tpu.memory_space<vmem>>, %arg18: memref<2x1x32xf32, #tpu.memory_space<vmem>>, %arg19: memref<2x1x32xf32, #tpu.memory_space<vmem>>, %arg20: memref<2x1x32xf32, #tpu.memory_space<vmem>>, %arg21: memref<32x2xf32, #tpu.memory_space<vmem>>, %arg22: memref<1x2xf32, #tpu.memory_space<vmem>>, %arg23: memref<2x2xf32, #tpu.memory_space<vmem>>) attributes {dimension_semantics = [#tpu.dimension_semantics<arbitrary>], iteration_bounds = array<i64: 1>, scalar_prefetch = 0 : i64, scratch_operands = 0 : i64, tpu.core_type = #tpu.core_type<tc>, window_params = [{pipeline_mode = #tpu.pipeline_mode<synchronous>, transform_indices = @transform_0, window_bounds = array<i64: 16, 32>}, {pipeline_mode = #tpu.pipeline_mode<synchronous>, transform_indices = @transform_1, window_bounds = array<i64: 16, 16>}, {pipeline_mode = #tpu.pipeline_mode<synchronous>, transform_indices = @transform_2, window_bounds = array<i64: 1, 32>}, {pipeline_mode = #tpu.pipeline_mode<synchronous>, transform_indices = @transform_3, window_bounds = array<i64: 1, 32>}, {pipeline_mode = #tpu.pipeline_mode<synchronous>, transform_indices = @transform_4, window_bounds = array<i64: 2, 2, 32, 16>}, {pipeline_mode = #tpu.pipeline_mode<synchronous>, transform_indices = @transform_5, window_bounds = array<i64: 2, 2, 1, 16>}, {pipeline_mode = #tpu.pipeline_mode<synchronous>, transform_indices = @transform_6, window_bounds = array<i64: 2, 2, 32, 16>}, {pipeline_mode = #tpu.pipeline_mode<synchronous>, transform_indices = @transform_7, window_bounds = array<i64: 2, 2, 1, 16>}, {pipeline_mode = #tpu.pipeline_mode<synchronous>, transform_indices = @transform_8, window_bounds = array<i64: 2, 2, 32, 16>}, {pipeline_mode = #tpu.pipeline_mode<synchronous>, transform_indices = @transform_9, window_bounds = array<i64: 2, 2, 1, 16>}, {pipeline_mode = #tpu.pipeline_mode<synchronous>, transform_indices = @transform_10, window_bounds = array<i64: 2, 2, 16, 32>}, {pipeline_mode = #tpu.pipeline_mode<synchronous>, transform_indices = @transform_11, window_bounds = array<i64: 2, 1, 32>}, {pipeline_mode = #tpu.pipeline_mode<synchronous>, transform_indices = @transform_12, window_bounds = array<i64: 2, 1, 32>}, {pipeline_mode = #tpu.pipeline_mode<synchronous>, transform_indices = @transform_13, window_bounds = array<i64: 2, 1, 32>}, {pipeline_mode = #tpu.pipeline_mode<synchronous>, transform_indices = @transform_14, window_bounds = array<i64: 2, 32, 64>}, {pipeline_mode = #tpu.pipeline_mode<synchronous>, transform_indices = @transform_15, window_bounds = array<i64: 2, 1, 64>}, {pipeline_mode = #tpu.pipeline_mode<synchronous>, transform_indices = @transform_16, window_bounds = array<i64: 2, 64, 32>}, {pipeline_mode = #tpu.pipeline_mode<synchronous>, transform_indices = @transform_17, window_bounds = array<i64: 2, 1, 32>}, {pipeline_mode = #tpu.pipeline_mode<synchronous>, transform_indices = @transform_18, window_bounds = array<i64: 2, 1, 32>}, {pipeline_mode = #tpu.pipeline_mode<synchronous>, transform_indices = @transform_19, window_bounds = array<i64: 2, 1, 32>}, {pipeline_mode = #tpu.pipeline_mode<synchronous>, transform_indices = @transform_20, window_bounds = array<i64: 32, 2>}, {pipeline_mode = #tpu.pipeline_mode<synchronous>, transform_indices = @transform_21, window_bounds = array<i64: 1, 2>}, {pipeline_mode = #tpu.pipeline_mode<synchronous>, transform_indices = @transform_22, window_bounds = array<i64: 2, 2>}]} {
    %c0 = arith.constant 0 : index
    %c0_0 = arith.constant 0 : index
    %0 = vector.load %arg1[%c0, %c0_0] : memref<16x32xf32, #tpu.memory_space<vmem>>, vector<16x32xf32>
    %c0_1 = arith.constant 0 : index
    %c0_2 = arith.constant 0 : index
    %1 = vector.load %arg3[%c0_1, %c0_2] : memref<1x32xf32, #tpu.memory_space<vmem>>, vector<1x32xf32>
    %c0_3 = arith.constant 0 : index
    %c0_4 = arith.constant 0 : index
    %2 = vector.load %arg4[%c0_3, %c0_4] : memref<1x32xf32, #tpu.memory_space<vmem>>, vector<1x32xf32>
    %cst = arith.constant dense<0.000000e+00> : vector<16xf32>
    %3 = vector.multi_reduction <add>, %0, %cst [1] : vector<16x32xf32> to vector<16xf32>
    %4 = vector.shape_cast %3 : vector<16xf32> to vector<16x1xf32>
    %cst_5 = arith.constant 3.200000e+01 : f32
    %5 = vector.broadcast %cst_5 : f32 to vector<16x1xf32>
    %6 = arith.divf %4, %5 : vector<16x1xf32>
    %7 = vector.broadcast %6 : vector<16x1xf32> to vector<16x32xf32>
    %8 = arith.subf %0, %7 : vector<16x32xf32>
    %9 = arith.mulf %8, %8 : vector<16x32xf32>
    %cst_6 = arith.constant dense<0.000000e+00> : vector<16xf32>
    %10 = vector.multi_reduction <add>, %9, %cst_6 [1] : vector<16x32xf32> to vector<16xf32>
    %11 = vector.shape_cast %10 : vector<16xf32> to vector<16x1xf32>
    %cst_7 = arith.constant 3.200000e+01 : f32
    %12 = vector.broadcast %cst_7 : f32 to vector<16x1xf32>
    %13 = arith.divf %11, %12 : vector<16x1xf32>
    %cst_8 = arith.constant 9.99999996E-13 : f32
    %14 = vector.broadcast %cst_8 : f32 to vector<16x1xf32>
    %15 = arith.addf %13, %14 : vector<16x1xf32>
    %16 = math.rsqrt %15 : vector<16x1xf32>
    %17 = vector.broadcast %6 : vector<16x1xf32> to vector<16x32xf32>
    %18 = arith.subf %0, %17 : vector<16x32xf32>
    %19 = vector.broadcast %16 : vector<16x1xf32> to vector<16x32xf32>
    %20 = arith.mulf %18, %19 : vector<16x32xf32>
    %21 = vector.broadcast %1 : vector<1x32xf32> to vector<16x32xf32>
    %22 = arith.mulf %20, %21 : vector<16x32xf32>
    %23 = vector.broadcast %2 : vector<1x32xf32> to vector<16x32xf32>
    %24 = arith.addf %22, %23 : vector<16x32xf32>
    %c0_9 = arith.constant 0 : index
    %c0_10 = arith.constant 0 : index
    %25 = vector.load %arg2[%c0_9, %c0_10] : memref<16x16xf32, #tpu.memory_space<vmem>>, vector<16x16xf32>
    %c0_11 = arith.constant 0 : index
    %c0_12 = arith.constant 0 : index
    %c0_13 = arith.constant 0 : index
    %26 = vector.load %arg12[%c0_11, %c0_12, %c0_13] : memref<2x1x32xf32, #tpu.memory_space<vmem>>, vector<1x1x32xf32>
    %27 = vector.shape_cast %26 : vector<1x1x32xf32> to vector<1x32xf32>
    %c0_14 = arith.constant 0 : index
    %c0_15 = arith.constant 0 : index
    %c0_16 = arith.constant 0 : index
    %c0_17 = arith.constant 0 : index
    %28 = vector.load %arg5[%c0_14, %c0_15, %c0_16, %c0_17] : memref<2x2x32x16xf32, #tpu.memory_space<vmem>>, vector<1x1x32x16xf32>
    %29 = vector.shape_cast %28 : vector<1x1x32x16xf32> to vector<32x16xf32>
    %cst_18 = arith.constant dense<0.000000e+00> : vector<16x16xf32>
    %30 = tpu.matmul %24, %29, %cst_18 {dimension_numbers = #tpu.dot_dimension_numbers<[1], [0], [0], [1], [0, 0, 1, 1], [], []>} : vector<16x32xf32>, vector<32x16xf32>, vector<16x16xf32> -> vector<16x16xf32>
    %c0_19 = arith.constant 0 : index
    %c0_20 = arith.constant 0 : index
    %c0_21 = arith.constant 0 : index
    %c0_22 = arith.constant 0 : index
    %31 = vector.load %arg6[%c0_19, %c0_20, %c0_21, %c0_22] : memref<2x2x1x16xf32, #tpu.memory_space<vmem>>, vector<1x1x1x16xf32>
    %32 = vector.shape_cast %31 : vector<1x1x1x16xf32> to vector<1x16xf32>
    %33 = vector.broadcast %32 : vector<1x16xf32> to vector<16x16xf32>
    %34 = arith.addf %30, %33 : vector<16x16xf32>
    %c0_23 = arith.constant 0 : index
    %c0_24 = arith.constant 0 : index
    %c0_25 = arith.constant 0 : index
    %c0_26 = arith.constant 0 : index
    %35 = vector.load %arg7[%c0_23, %c0_24, %c0_25, %c0_26] : memref<2x2x32x16xf32, #tpu.memory_space<vmem>>, vector<1x1x32x16xf32>
    %36 = vector.shape_cast %35 : vector<1x1x32x16xf32> to vector<32x16xf32>
    %cst_27 = arith.constant dense<0.000000e+00> : vector<16x16xf32>
    %37 = tpu.matmul %24, %36, %cst_27 {dimension_numbers = #tpu.dot_dimension_numbers<[1], [0], [0], [1], [0, 0, 1, 1], [], []>} : vector<16x32xf32>, vector<32x16xf32>, vector<16x16xf32> -> vector<16x16xf32>
    %c0_28 = arith.constant 0 : index
    %c0_29 = arith.constant 0 : index
    %c0_30 = arith.constant 0 : index
    %c0_31 = arith.constant 0 : index
    %38 = vector.load %arg8[%c0_28, %c0_29, %c0_30, %c0_31] : memref<2x2x1x16xf32, #tpu.memory_space<vmem>>, vector<1x1x1x16xf32>
    %39 = vector.shape_cast %38 : vector<1x1x1x16xf32> to vector<1x16xf32>
    %40 = vector.broadcast %39 : vector<1x16xf32> to vector<16x16xf32>
    %41 = arith.addf %37, %40 : vector<16x16xf32>
    %c0_32 = arith.constant 0 : index
    %c0_33 = arith.constant 0 : index
    %c0_34 = arith.constant 0 : index
    %c0_35 = arith.constant 0 : index
    %42 = vector.load %arg9[%c0_32, %c0_33, %c0_34, %c0_35] : memref<2x2x32x16xf32, #tpu.memory_space<vmem>>, vector<1x1x32x16xf32>
    %43 = vector.shape_cast %42 : vector<1x1x32x16xf32> to vector<32x16xf32>
    %cst_36 = arith.constant dense<0.000000e+00> : vector<16x16xf32>
    %44 = tpu.matmul %24, %43, %cst_36 {dimension_numbers = #tpu.dot_dimension_numbers<[1], [0], [0], [1], [0, 0, 1, 1], [], []>} : vector<16x32xf32>, vector<32x16xf32>, vector<16x16xf32> -> vector<16x16xf32>
    %c0_37 = arith.constant 0 : index
    %c0_38 = arith.constant 0 : index
    %c0_39 = arith.constant 0 : index
    %c0_40 = arith.constant 0 : index
    %45 = vector.load %arg10[%c0_37, %c0_38, %c0_39, %c0_40] : memref<2x2x1x16xf32, #tpu.memory_space<vmem>>, vector<1x1x1x16xf32>
    %46 = vector.shape_cast %45 : vector<1x1x1x16xf32> to vector<1x16xf32>
    %47 = vector.broadcast %46 : vector<1x16xf32> to vector<16x16xf32>
    %48 = arith.addf %44, %47 : vector<16x16xf32>
    %cst_41 = arith.constant dense<0.000000e+00> : vector<16x16xf32>
    %49 = tpu.matmul %34, %41, %cst_41 {dimension_numbers = #tpu.dot_dimension_numbers<[1], [1], [0], [0], [0, 0, 1, 0], [], []>} : vector<16x16xf32>, vector<16x16xf32>, vector<16x16xf32> -> vector<16x16xf32>
    %50 = arith.addf %49, %25 : vector<16x16xf32>
    %cst_42 = arith.constant dense<0xFF800000> : vector<16xf32>
    %51 = vector.multi_reduction <maximumf>, %50, %cst_42 [1] : vector<16x16xf32> to vector<16xf32>
    %52 = vector.shape_cast %51 : vector<16xf32> to vector<16x1xf32>
    %53 = vector.broadcast %52 : vector<16x1xf32> to vector<16x16xf32>
    %54 = arith.subf %50, %53 : vector<16x16xf32>
    %55 = math.exp %54 : vector<16x16xf32>
    %cst_43 = arith.constant dense<0.000000e+00> : vector<16xf32>
    %56 = vector.multi_reduction <add>, %55, %cst_43 [1] : vector<16x16xf32> to vector<16xf32>
    %57 = vector.shape_cast %56 : vector<16xf32> to vector<16x1xf32>
    %58 = tpu.reciprocal %57 {approx = true} : vector<16x1xf32> -> vector<16x1xf32>
    %59 = vector.broadcast %58 : vector<16x1xf32> to vector<16x16xf32>
    %60 = arith.mulf %55, %59 : vector<16x16xf32>
    %cst_44 = arith.constant dense<0.000000e+00> : vector<16x16xf32>
    %61 = tpu.matmul %60, %48, %cst_44 {dimension_numbers = #tpu.dot_dimension_numbers<[1], [0], [0], [1], [0, 0, 1, 1], [], []>} : vector<16x16xf32>, vector<16x16xf32>, vector<16x16xf32> -> vector<16x16xf32>
    %c0_45 = arith.constant 0 : index
    %c0_46 = arith.constant 0 : index
    %c0_47 = arith.constant 0 : index
    %c0_48 = arith.constant 0 : index
    %62 = vector.load %arg11[%c0_45, %c0_46, %c0_47, %c0_48] : memref<2x2x16x32xf32, #tpu.memory_space<vmem>>, vector<1x1x16x32xf32>
    %63 = vector.shape_cast %62 : vector<1x1x16x32xf32> to vector<16x32xf32>
    %cst_49 = arith.constant dense<0.000000e+00> : vector<16x32xf32>
    %64 = tpu.matmul %61, %63, %cst_49 {dimension_numbers = #tpu.dot_dimension_numbers<[1], [0], [0], [1], [0, 0, 1, 1], [], []>} : vector<16x16xf32>, vector<16x32xf32>, vector<16x32xf32> -> vector<16x32xf32>
    %65 = vector.broadcast %27 : vector<1x32xf32> to vector<16x32xf32>
    %66 = arith.addf %65, %64 : vector<16x32xf32>
    %c0_50 = arith.constant 0 : index
    %c1 = arith.constant 1 : index
    %c0_51 = arith.constant 0 : index
    %c0_52 = arith.constant 0 : index
    %67 = vector.load %arg5[%c0_50, %c1, %c0_51, %c0_52] : memref<2x2x32x16xf32, #tpu.memory_space<vmem>>, vector<1x1x32x16xf32>
    %68 = vector.shape_cast %67 : vector<1x1x32x16xf32> to vector<32x16xf32>
    %cst_53 = arith.constant dense<0.000000e+00> : vector<16x16xf32>
    %69 = tpu.matmul %24, %68, %cst_53 {dimension_numbers = #tpu.dot_dimension_numbers<[1], [0], [0], [1], [0, 0, 1, 1], [], []>} : vector<16x32xf32>, vector<32x16xf32>, vector<16x16xf32> -> vector<16x16xf32>
    %c0_54 = arith.constant 0 : index
    %c1_55 = arith.constant 1 : index
    %c0_56 = arith.constant 0 : index
    %c0_57 = arith.constant 0 : index
    %70 = vector.load %arg6[%c0_54, %c1_55, %c0_56, %c0_57] : memref<2x2x1x16xf32, #tpu.memory_space<vmem>>, vector<1x1x1x16xf32>
    %71 = vector.shape_cast %70 : vector<1x1x1x16xf32> to vector<1x16xf32>
    %72 = vector.broadcast %71 : vector<1x16xf32> to vector<16x16xf32>
    %73 = arith.addf %69, %72 : vector<16x16xf32>
    %c0_58 = arith.constant 0 : index
    %c1_59 = arith.constant 1 : index
    %c0_60 = arith.constant 0 : index
    %c0_61 = arith.constant 0 : index
    %74 = vector.load %arg7[%c0_58, %c1_59, %c0_60, %c0_61] : memref<2x2x32x16xf32, #tpu.memory_space<vmem>>, vector<1x1x32x16xf32>
    %75 = vector.shape_cast %74 : vector<1x1x32x16xf32> to vector<32x16xf32>
    %cst_62 = arith.constant dense<0.000000e+00> : vector<16x16xf32>
    %76 = tpu.matmul %24, %75, %cst_62 {dimension_numbers = #tpu.dot_dimension_numbers<[1], [0], [0], [1], [0, 0, 1, 1], [], []>} : vector<16x32xf32>, vector<32x16xf32>, vector<16x16xf32> -> vector<16x16xf32>
    %c0_63 = arith.constant 0 : index
    %c1_64 = arith.constant 1 : index
    %c0_65 = arith.constant 0 : index
    %c0_66 = arith.constant 0 : index
    %77 = vector.load %arg8[%c0_63, %c1_64, %c0_65, %c0_66] : memref<2x2x1x16xf32, #tpu.memory_space<vmem>>, vector<1x1x1x16xf32>
    %78 = vector.shape_cast %77 : vector<1x1x1x16xf32> to vector<1x16xf32>
    %79 = vector.broadcast %78 : vector<1x16xf32> to vector<16x16xf32>
    %80 = arith.addf %76, %79 : vector<16x16xf32>
    %c0_67 = arith.constant 0 : index
    %c1_68 = arith.constant 1 : index
    %c0_69 = arith.constant 0 : index
    %c0_70 = arith.constant 0 : index
    %81 = vector.load %arg9[%c0_67, %c1_68, %c0_69, %c0_70] : memref<2x2x32x16xf32, #tpu.memory_space<vmem>>, vector<1x1x32x16xf32>
    %82 = vector.shape_cast %81 : vector<1x1x32x16xf32> to vector<32x16xf32>
    %cst_71 = arith.constant dense<0.000000e+00> : vector<16x16xf32>
    %83 = tpu.matmul %24, %82, %cst_71 {dimension_numbers = #tpu.dot_dimension_numbers<[1], [0], [0], [1], [0, 0, 1, 1], [], []>} : vector<16x32xf32>, vector<32x16xf32>, vector<16x16xf32> -> vector<16x16xf32>
    %c0_72 = arith.constant 0 : index
    %c1_73 = arith.constant 1 : index
    %c0_74 = arith.constant 0 : index
    %c0_75 = arith.constant 0 : index
    %84 = vector.load %arg10[%c0_72, %c1_73, %c0_74, %c0_75] : memref<2x2x1x16xf32, #tpu.memory_space<vmem>>, vector<1x1x1x16xf32>
    %85 = vector.shape_cast %84 : vector<1x1x1x16xf32> to vector<1x16xf32>
    %86 = vector.broadcast %85 : vector<1x16xf32> to vector<16x16xf32>
    %87 = arith.addf %83, %86 : vector<16x16xf32>
    %cst_76 = arith.constant dense<0.000000e+00> : vector<16x16xf32>
    %88 = tpu.matmul %73, %80, %cst_76 {dimension_numbers = #tpu.dot_dimension_numbers<[1], [1], [0], [0], [0, 0, 1, 0], [], []>} : vector<16x16xf32>, vector<16x16xf32>, vector<16x16xf32> -> vector<16x16xf32>
    %89 = arith.addf %88, %25 : vector<16x16xf32>
    %cst_77 = arith.constant dense<0xFF800000> : vector<16xf32>
    %90 = vector.multi_reduction <maximumf>, %89, %cst_77 [1] : vector<16x16xf32> to vector<16xf32>
    %91 = vector.shape_cast %90 : vector<16xf32> to vector<16x1xf32>
    %92 = vector.broadcast %91 : vector<16x1xf32> to vector<16x16xf32>
    %93 = arith.subf %89, %92 : vector<16x16xf32>
    %94 = math.exp %93 : vector<16x16xf32>
    %cst_78 = arith.constant dense<0.000000e+00> : vector<16xf32>
    %95 = vector.multi_reduction <add>, %94, %cst_78 [1] : vector<16x16xf32> to vector<16xf32>
    %96 = vector.shape_cast %95 : vector<16xf32> to vector<16x1xf32>
    %97 = tpu.reciprocal %96 {approx = true} : vector<16x1xf32> -> vector<16x1xf32>
    %98 = vector.broadcast %97 : vector<16x1xf32> to vector<16x16xf32>
    %99 = arith.mulf %94, %98 : vector<16x16xf32>
    %cst_79 = arith.constant dense<0.000000e+00> : vector<16x16xf32>
    %100 = tpu.matmul %99, %87, %cst_79 {dimension_numbers = #tpu.dot_dimension_numbers<[1], [0], [0], [1], [0, 0, 1, 1], [], []>} : vector<16x16xf32>, vector<16x16xf32>, vector<16x16xf32> -> vector<16x16xf32>
    %c0_80 = arith.constant 0 : index
    %c1_81 = arith.constant 1 : index
    %c0_82 = arith.constant 0 : index
    %c0_83 = arith.constant 0 : index
    %101 = vector.load %arg11[%c0_80, %c1_81, %c0_82, %c0_83] : memref<2x2x16x32xf32, #tpu.memory_space<vmem>>, vector<1x1x16x32xf32>
    %102 = vector.shape_cast %101 : vector<1x1x16x32xf32> to vector<16x32xf32>
    %cst_84 = arith.constant dense<0.000000e+00> : vector<16x32xf32>
    %103 = tpu.matmul %100, %102, %cst_84 {dimension_numbers = #tpu.dot_dimension_numbers<[1], [0], [0], [1], [0, 0, 1, 1], [], []>} : vector<16x16xf32>, vector<16x32xf32>, vector<16x32xf32> -> vector<16x32xf32>
    %104 = arith.addf %66, %103 : vector<16x32xf32>
    %105 = arith.addf %24, %104 : vector<16x32xf32>
    %c0_85 = arith.constant 0 : index
    %c0_86 = arith.constant 0 : index
    %c0_87 = arith.constant 0 : index
    %106 = vector.load %arg13[%c0_85, %c0_86, %c0_87] : memref<2x1x32xf32, #tpu.memory_space<vmem>>, vector<1x1x32xf32>
    %107 = vector.shape_cast %106 : vector<1x1x32xf32> to vector<1x32xf32>
    %c0_88 = arith.constant 0 : index
    %c0_89 = arith.constant 0 : index
    %c0_90 = arith.constant 0 : index
    %108 = vector.load %arg14[%c0_88, %c0_89, %c0_90] : memref<2x1x32xf32, #tpu.memory_space<vmem>>, vector<1x1x32xf32>
    %109 = vector.shape_cast %108 : vector<1x1x32xf32> to vector<1x32xf32>
    %cst_91 = arith.constant dense<0.000000e+00> : vector<16xf32>
    %110 = vector.multi_reduction <add>, %105, %cst_91 [1] : vector<16x32xf32> to vector<16xf32>
    %111 = vector.shape_cast %110 : vector<16xf32> to vector<16x1xf32>
    %cst_92 = arith.constant 3.200000e+01 : f32
    %112 = vector.broadcast %cst_92 : f32 to vector<16x1xf32>
    %113 = arith.divf %111, %112 : vector<16x1xf32>
    %114 = vector.broadcast %113 : vector<16x1xf32> to vector<16x32xf32>
    %115 = arith.subf %105, %114 : vector<16x32xf32>
    %116 = arith.mulf %115, %115 : vector<16x32xf32>
    %cst_93 = arith.constant dense<0.000000e+00> : vector<16xf32>
    %117 = vector.multi_reduction <add>, %116, %cst_93 [1] : vector<16x32xf32> to vector<16xf32>
    %118 = vector.shape_cast %117 : vector<16xf32> to vector<16x1xf32>
    %cst_94 = arith.constant 3.200000e+01 : f32
    %119 = vector.broadcast %cst_94 : f32 to vector<16x1xf32>
    %120 = arith.divf %118, %119 : vector<16x1xf32>
    %cst_95 = arith.constant 9.99999996E-13 : f32
    %121 = vector.broadcast %cst_95 : f32 to vector<16x1xf32>
    %122 = arith.addf %120, %121 : vector<16x1xf32>
    %123 = math.rsqrt %122 : vector<16x1xf32>
    %124 = vector.broadcast %113 : vector<16x1xf32> to vector<16x32xf32>
    %125 = arith.subf %105, %124 : vector<16x32xf32>
    %126 = vector.broadcast %123 : vector<16x1xf32> to vector<16x32xf32>
    %127 = arith.mulf %125, %126 : vector<16x32xf32>
    %128 = vector.broadcast %107 : vector<1x32xf32> to vector<16x32xf32>
    %129 = arith.mulf %127, %128 : vector<16x32xf32>
    %130 = vector.broadcast %109 : vector<1x32xf32> to vector<16x32xf32>
    %131 = arith.addf %129, %130 : vector<16x32xf32>
    %c0_96 = arith.constant 0 : index
    %c0_97 = arith.constant 0 : index
    %c0_98 = arith.constant 0 : index
    %132 = vector.load %arg15[%c0_96, %c0_97, %c0_98] : memref<2x32x64xf32, #tpu.memory_space<vmem>>, vector<1x32x64xf32>
    %133 = vector.shape_cast %132 : vector<1x32x64xf32> to vector<32x64xf32>
    %cst_99 = arith.constant dense<0.000000e+00> : vector<16x64xf32>
    %134 = tpu.matmul %131, %133, %cst_99 {dimension_numbers = #tpu.dot_dimension_numbers<[1], [0], [0], [1], [0, 0, 1, 1], [], []>} : vector<16x32xf32>, vector<32x64xf32>, vector<16x64xf32> -> vector<16x64xf32>
    %c0_100 = arith.constant 0 : index
    %c0_101 = arith.constant 0 : index
    %c0_102 = arith.constant 0 : index
    %135 = vector.load %arg16[%c0_100, %c0_101, %c0_102] : memref<2x1x64xf32, #tpu.memory_space<vmem>>, vector<1x1x64xf32>
    %136 = vector.shape_cast %135 : vector<1x1x64xf32> to vector<1x64xf32>
    %137 = vector.broadcast %136 : vector<1x64xf32> to vector<16x64xf32>
    %138 = arith.addf %134, %137 : vector<16x64xf32>
    %cst_103 = arith.constant 5.000000e-01 : f32
    %139 = vector.broadcast %cst_103 : f32 to vector<16x64xf32>
    %140 = arith.mulf %139, %138 : vector<16x64xf32>
    %cst_104 = arith.constant 4.471500e-02 : f32
    %141 = vector.broadcast %cst_104 : f32 to vector<16x64xf32>
    %142 = arith.mulf %141, %138 : vector<16x64xf32>
    %143 = arith.mulf %142, %138 : vector<16x64xf32>
    %144 = arith.mulf %143, %138 : vector<16x64xf32>
    %145 = arith.addf %138, %144 : vector<16x64xf32>
    %cst_105 = arith.constant 0.797884583 : f32
    %146 = vector.broadcast %cst_105 : f32 to vector<16x64xf32>
    %147 = arith.mulf %146, %145 : vector<16x64xf32>
    %148 = math.tanh %147 : vector<16x64xf32>
    %cst_106 = arith.constant 1.000000e+00 : f32
    %149 = vector.broadcast %cst_106 : f32 to vector<16x64xf32>
    %150 = arith.addf %149, %148 : vector<16x64xf32>
    %151 = arith.mulf %140, %150 : vector<16x64xf32>
    %c0_107 = arith.constant 0 : index
    %c0_108 = arith.constant 0 : index
    %c0_109 = arith.constant 0 : index
    %152 = vector.load %arg17[%c0_107, %c0_108, %c0_109] : memref<2x64x32xf32, #tpu.memory_space<vmem>>, vector<1x64x32xf32>
    %153 = vector.shape_cast %152 : vector<1x64x32xf32> to vector<64x32xf32>
    %cst_110 = arith.constant dense<0.000000e+00> : vector<16x32xf32>
    %154 = tpu.matmul %151, %153, %cst_110 {dimension_numbers = #tpu.dot_dimension_numbers<[1], [0], [0], [1], [0, 0, 1, 1], [], []>} : vector<16x64xf32>, vector<64x32xf32>, vector<16x32xf32> -> vector<16x32xf32>
    %c0_111 = arith.constant 0 : index
    %c0_112 = arith.constant 0 : index
    %c0_113 = arith.constant 0 : index
    %155 = vector.load %arg18[%c0_111, %c0_112, %c0_113] : memref<2x1x32xf32, #tpu.memory_space<vmem>>, vector<1x1x32xf32>
    %156 = vector.shape_cast %155 : vector<1x1x32xf32> to vector<1x32xf32>
    %157 = vector.broadcast %156 : vector<1x32xf32> to vector<16x32xf32>
    %158 = arith.addf %154, %157 : vector<16x32xf32>
    %159 = arith.addf %131, %158 : vector<16x32xf32>
    %c0_114 = arith.constant 0 : index
    %c0_115 = arith.constant 0 : index
    %c0_116 = arith.constant 0 : index
    %160 = vector.load %arg19[%c0_114, %c0_115, %c0_116] : memref<2x1x32xf32, #tpu.memory_space<vmem>>, vector<1x1x32xf32>
    %161 = vector.shape_cast %160 : vector<1x1x32xf32> to vector<1x32xf32>
    %c0_117 = arith.constant 0 : index
    %c0_118 = arith.constant 0 : index
    %c0_119 = arith.constant 0 : index
    %162 = vector.load %arg20[%c0_117, %c0_118, %c0_119] : memref<2x1x32xf32, #tpu.memory_space<vmem>>, vector<1x1x32xf32>
    %163 = vector.shape_cast %162 : vector<1x1x32xf32> to vector<1x32xf32>
    %cst_120 = arith.constant dense<0.000000e+00> : vector<16xf32>
    %164 = vector.multi_reduction <add>, %159, %cst_120 [1] : vector<16x32xf32> to vector<16xf32>
    %165 = vector.shape_cast %164 : vector<16xf32> to vector<16x1xf32>
    %cst_121 = arith.constant 3.200000e+01 : f32
    %166 = vector.broadcast %cst_121 : f32 to vector<16x1xf32>
    %167 = arith.divf %165, %166 : vector<16x1xf32>
    %168 = vector.broadcast %167 : vector<16x1xf32> to vector<16x32xf32>
    %169 = arith.subf %159, %168 : vector<16x32xf32>
    %170 = arith.mulf %169, %169 : vector<16x32xf32>
    %cst_122 = arith.constant dense<0.000000e+00> : vector<16xf32>
    %171 = vector.multi_reduction <add>, %170, %cst_122 [1] : vector<16x32xf32> to vector<16xf32>
    %172 = vector.shape_cast %171 : vector<16xf32> to vector<16x1xf32>
    %cst_123 = arith.constant 3.200000e+01 : f32
    %173 = vector.broadcast %cst_123 : f32 to vector<16x1xf32>
    %174 = arith.divf %172, %173 : vector<16x1xf32>
    %cst_124 = arith.constant 9.99999996E-13 : f32
    %175 = vector.broadcast %cst_124 : f32 to vector<16x1xf32>
    %176 = arith.addf %174, %175 : vector<16x1xf32>
    %177 = math.rsqrt %176 : vector<16x1xf32>
    %178 = vector.broadcast %167 : vector<16x1xf32> to vector<16x32xf32>
    %179 = arith.subf %159, %178 : vector<16x32xf32>
    %180 = vector.broadcast %177 : vector<16x1xf32> to vector<16x32xf32>
    %181 = arith.mulf %179, %180 : vector<16x32xf32>
    %182 = vector.broadcast %161 : vector<1x32xf32> to vector<16x32xf32>
    %183 = arith.mulf %181, %182 : vector<16x32xf32>
    %184 = vector.broadcast %163 : vector<1x32xf32> to vector<16x32xf32>
    %185 = arith.addf %183, %184 : vector<16x32xf32>
    %c1_125 = arith.constant 1 : index
    %c0_126 = arith.constant 0 : index
    %c0_127 = arith.constant 0 : index
    %186 = vector.load %arg12[%c1_125, %c0_126, %c0_127] : memref<2x1x32xf32, #tpu.memory_space<vmem>>, vector<1x1x32xf32>
    %187 = vector.shape_cast %186 : vector<1x1x32xf32> to vector<1x32xf32>
    %c1_128 = arith.constant 1 : index
    %c0_129 = arith.constant 0 : index
    %c0_130 = arith.constant 0 : index
    %c0_131 = arith.constant 0 : index
    %188 = vector.load %arg5[%c1_128, %c0_129, %c0_130, %c0_131] : memref<2x2x32x16xf32, #tpu.memory_space<vmem>>, vector<1x1x32x16xf32>
    %189 = vector.shape_cast %188 : vector<1x1x32x16xf32> to vector<32x16xf32>
    %cst_132 = arith.constant dense<0.000000e+00> : vector<16x16xf32>
    %190 = tpu.matmul %185, %189, %cst_132 {dimension_numbers = #tpu.dot_dimension_numbers<[1], [0], [0], [1], [0, 0, 1, 1], [], []>} : vector<16x32xf32>, vector<32x16xf32>, vector<16x16xf32> -> vector<16x16xf32>
    %c1_133 = arith.constant 1 : index
    %c0_134 = arith.constant 0 : index
    %c0_135 = arith.constant 0 : index
    %c0_136 = arith.constant 0 : index
    %191 = vector.load %arg6[%c1_133, %c0_134, %c0_135, %c0_136] : memref<2x2x1x16xf32, #tpu.memory_space<vmem>>, vector<1x1x1x16xf32>
    %192 = vector.shape_cast %191 : vector<1x1x1x16xf32> to vector<1x16xf32>
    %193 = vector.broadcast %192 : vector<1x16xf32> to vector<16x16xf32>
    %194 = arith.addf %190, %193 : vector<16x16xf32>
    %c1_137 = arith.constant 1 : index
    %c0_138 = arith.constant 0 : index
    %c0_139 = arith.constant 0 : index
    %c0_140 = arith.constant 0 : index
    %195 = vector.load %arg7[%c1_137, %c0_138, %c0_139, %c0_140] : memref<2x2x32x16xf32, #tpu.memory_space<vmem>>, vector<1x1x32x16xf32>
    %196 = vector.shape_cast %195 : vector<1x1x32x16xf32> to vector<32x16xf32>
    %cst_141 = arith.constant dense<0.000000e+00> : vector<16x16xf32>
    %197 = tpu.matmul %185, %196, %cst_141 {dimension_numbers = #tpu.dot_dimension_numbers<[1], [0], [0], [1], [0, 0, 1, 1], [], []>} : vector<16x32xf32>, vector<32x16xf32>, vector<16x16xf32> -> vector<16x16xf32>
    %c1_142 = arith.constant 1 : index
    %c0_143 = arith.constant 0 : index
    %c0_144 = arith.constant 0 : index
    %c0_145 = arith.constant 0 : index
    %198 = vector.load %arg8[%c1_142, %c0_143, %c0_144, %c0_145] : memref<2x2x1x16xf32, #tpu.memory_space<vmem>>, vector<1x1x1x16xf32>
    %199 = vector.shape_cast %198 : vector<1x1x1x16xf32> to vector<1x16xf32>
    %200 = vector.broadcast %199 : vector<1x16xf32> to vector<16x16xf32>
    %201 = arith.addf %197, %200 : vector<16x16xf32>
    %c1_146 = arith.constant 1 : index
    %c0_147 = arith.constant 0 : index
    %c0_148 = arith.constant 0 : index
    %c0_149 = arith.constant 0 : index
    %202 = vector.load %arg9[%c1_146, %c0_147, %c0_148, %c0_149] : memref<2x2x32x16xf32, #tpu.memory_space<vmem>>, vector<1x1x32x16xf32>
    %203 = vector.shape_cast %202 : vector<1x1x32x16xf32> to vector<32x16xf32>
    %cst_150 = arith.constant dense<0.000000e+00> : vector<16x16xf32>
    %204 = tpu.matmul %185, %203, %cst_150 {dimension_numbers = #tpu.dot_dimension_numbers<[1], [0], [0], [1], [0, 0, 1, 1], [], []>} : vector<16x32xf32>, vector<32x16xf32>, vector<16x16xf32> -> vector<16x16xf32>
    %c1_151 = arith.constant 1 : index
    %c0_152 = arith.constant 0 : index
    %c0_153 = arith.constant 0 : index
    %c0_154 = arith.constant 0 : index
    %205 = vector.load %arg10[%c1_151, %c0_152, %c0_153, %c0_154] : memref<2x2x1x16xf32, #tpu.memory_space<vmem>>, vector<1x1x1x16xf32>
    %206 = vector.shape_cast %205 : vector<1x1x1x16xf32> to vector<1x16xf32>
    %207 = vector.broadcast %206 : vector<1x16xf32> to vector<16x16xf32>
    %208 = arith.addf %204, %207 : vector<16x16xf32>
    %cst_155 = arith.constant dense<0.000000e+00> : vector<16x16xf32>
    %209 = tpu.matmul %194, %201, %cst_155 {dimension_numbers = #tpu.dot_dimension_numbers<[1], [1], [0], [0], [0, 0, 1, 0], [], []>} : vector<16x16xf32>, vector<16x16xf32>, vector<16x16xf32> -> vector<16x16xf32>
    %210 = arith.addf %209, %25 : vector<16x16xf32>
    %cst_156 = arith.constant dense<0xFF800000> : vector<16xf32>
    %211 = vector.multi_reduction <maximumf>, %210, %cst_156 [1] : vector<16x16xf32> to vector<16xf32>
    %212 = vector.shape_cast %211 : vector<16xf32> to vector<16x1xf32>
    %213 = vector.broadcast %212 : vector<16x1xf32> to vector<16x16xf32>
    %214 = arith.subf %210, %213 : vector<16x16xf32>
    %215 = math.exp %214 : vector<16x16xf32>
    %cst_157 = arith.constant dense<0.000000e+00> : vector<16xf32>
    %216 = vector.multi_reduction <add>, %215, %cst_157 [1] : vector<16x16xf32> to vector<16xf32>
    %217 = vector.shape_cast %216 : vector<16xf32> to vector<16x1xf32>
    %218 = tpu.reciprocal %217 {approx = true} : vector<16x1xf32> -> vector<16x1xf32>
    %219 = vector.broadcast %218 : vector<16x1xf32> to vector<16x16xf32>
    %220 = arith.mulf %215, %219 : vector<16x16xf32>
    %cst_158 = arith.constant dense<0.000000e+00> : vector<16x16xf32>
    %221 = tpu.matmul %220, %208, %cst_158 {dimension_numbers = #tpu.dot_dimension_numbers<[1], [0], [0], [1], [0, 0, 1, 1], [], []>} : vector<16x16xf32>, vector<16x16xf32>, vector<16x16xf32> -> vector<16x16xf32>
    %c1_159 = arith.constant 1 : index
    %c0_160 = arith.constant 0 : index
    %c0_161 = arith.constant 0 : index
    %c0_162 = arith.constant 0 : index
    %222 = vector.load %arg11[%c1_159, %c0_160, %c0_161, %c0_162] : memref<2x2x16x32xf32, #tpu.memory_space<vmem>>, vector<1x1x16x32xf32>
    %223 = vector.shape_cast %222 : vector<1x1x16x32xf32> to vector<16x32xf32>
    %cst_163 = arith.constant dense<0.000000e+00> : vector<16x32xf32>
    %224 = tpu.matmul %221, %223, %cst_163 {dimension_numbers = #tpu.dot_dimension_numbers<[1], [0], [0], [1], [0, 0, 1, 1], [], []>} : vector<16x16xf32>, vector<16x32xf32>, vector<16x32xf32> -> vector<16x32xf32>
    %225 = vector.broadcast %187 : vector<1x32xf32> to vector<16x32xf32>
    %226 = arith.addf %225, %224 : vector<16x32xf32>
    %c1_164 = arith.constant 1 : index
    %c1_165 = arith.constant 1 : index
    %c0_166 = arith.constant 0 : index
    %c0_167 = arith.constant 0 : index
    %227 = vector.load %arg5[%c1_164, %c1_165, %c0_166, %c0_167] : memref<2x2x32x16xf32, #tpu.memory_space<vmem>>, vector<1x1x32x16xf32>
    %228 = vector.shape_cast %227 : vector<1x1x32x16xf32> to vector<32x16xf32>
    %cst_168 = arith.constant dense<0.000000e+00> : vector<16x16xf32>
    %229 = tpu.matmul %185, %228, %cst_168 {dimension_numbers = #tpu.dot_dimension_numbers<[1], [0], [0], [1], [0, 0, 1, 1], [], []>} : vector<16x32xf32>, vector<32x16xf32>, vector<16x16xf32> -> vector<16x16xf32>
    %c1_169 = arith.constant 1 : index
    %c1_170 = arith.constant 1 : index
    %c0_171 = arith.constant 0 : index
    %c0_172 = arith.constant 0 : index
    %230 = vector.load %arg6[%c1_169, %c1_170, %c0_171, %c0_172] : memref<2x2x1x16xf32, #tpu.memory_space<vmem>>, vector<1x1x1x16xf32>
    %231 = vector.shape_cast %230 : vector<1x1x1x16xf32> to vector<1x16xf32>
    %232 = vector.broadcast %231 : vector<1x16xf32> to vector<16x16xf32>
    %233 = arith.addf %229, %232 : vector<16x16xf32>
    %c1_173 = arith.constant 1 : index
    %c1_174 = arith.constant 1 : index
    %c0_175 = arith.constant 0 : index
    %c0_176 = arith.constant 0 : index
    %234 = vector.load %arg7[%c1_173, %c1_174, %c0_175, %c0_176] : memref<2x2x32x16xf32, #tpu.memory_space<vmem>>, vector<1x1x32x16xf32>
    %235 = vector.shape_cast %234 : vector<1x1x32x16xf32> to vector<32x16xf32>
    %cst_177 = arith.constant dense<0.000000e+00> : vector<16x16xf32>
    %236 = tpu.matmul %185, %235, %cst_177 {dimension_numbers = #tpu.dot_dimension_numbers<[1], [0], [0], [1], [0, 0, 1, 1], [], []>} : vector<16x32xf32>, vector<32x16xf32>, vector<16x16xf32> -> vector<16x16xf32>
    %c1_178 = arith.constant 1 : index
    %c1_179 = arith.constant 1 : index
    %c0_180 = arith.constant 0 : index
    %c0_181 = arith.constant 0 : index
    %237 = vector.load %arg8[%c1_178, %c1_179, %c0_180, %c0_181] : memref<2x2x1x16xf32, #tpu.memory_space<vmem>>, vector<1x1x1x16xf32>
    %238 = vector.shape_cast %237 : vector<1x1x1x16xf32> to vector<1x16xf32>
    %239 = vector.broadcast %238 : vector<1x16xf32> to vector<16x16xf32>
    %240 = arith.addf %236, %239 : vector<16x16xf32>
    %c1_182 = arith.constant 1 : index
    %c1_183 = arith.constant 1 : index
    %c0_184 = arith.constant 0 : index
    %c0_185 = arith.constant 0 : index
    %241 = vector.load %arg9[%c1_182, %c1_183, %c0_184, %c0_185] : memref<2x2x32x16xf32, #tpu.memory_space<vmem>>, vector<1x1x32x16xf32>
    %242 = vector.shape_cast %241 : vector<1x1x32x16xf32> to vector<32x16xf32>
    %cst_186 = arith.constant dense<0.000000e+00> : vector<16x16xf32>
    %243 = tpu.matmul %185, %242, %cst_186 {dimension_numbers = #tpu.dot_dimension_numbers<[1], [0], [0], [1], [0, 0, 1, 1], [], []>} : vector<16x32xf32>, vector<32x16xf32>, vector<16x16xf32> -> vector<16x16xf32>
    %c1_187 = arith.constant 1 : index
    %c1_188 = arith.constant 1 : index
    %c0_189 = arith.constant 0 : index
    %c0_190 = arith.constant 0 : index
    %244 = vector.load %arg10[%c1_187, %c1_188, %c0_189, %c0_190] : memref<2x2x1x16xf32, #tpu.memory_space<vmem>>, vector<1x1x1x16xf32>
    %245 = vector.shape_cast %244 : vector<1x1x1x16xf32> to vector<1x16xf32>
    %246 = vector.broadcast %245 : vector<1x16xf32> to vector<16x16xf32>
    %247 = arith.addf %243, %246 : vector<16x16xf32>
    %cst_191 = arith.constant dense<0.000000e+00> : vector<16x16xf32>
    %248 = tpu.matmul %233, %240, %cst_191 {dimension_numbers = #tpu.dot_dimension_numbers<[1], [1], [0], [0], [0, 0, 1, 0], [], []>} : vector<16x16xf32>, vector<16x16xf32>, vector<16x16xf32> -> vector<16x16xf32>
    %249 = arith.addf %248, %25 : vector<16x16xf32>
    %cst_192 = arith.constant dense<0xFF800000> : vector<16xf32>
    %250 = vector.multi_reduction <maximumf>, %249, %cst_192 [1] : vector<16x16xf32> to vector<16xf32>
    %251 = vector.shape_cast %250 : vector<16xf32> to vector<16x1xf32>
    %252 = vector.broadcast %251 : vector<16x1xf32> to vector<16x16xf32>
    %253 = arith.subf %249, %252 : vector<16x16xf32>
    %254 = math.exp %253 : vector<16x16xf32>
    %cst_193 = arith.constant dense<0.000000e+00> : vector<16xf32>
    %255 = vector.multi_reduction <add>, %254, %cst_193 [1] : vector<16x16xf32> to vector<16xf32>
    %256 = vector.shape_cast %255 : vector<16xf32> to vector<16x1xf32>
    %257 = tpu.reciprocal %256 {approx = true} : vector<16x1xf32> -> vector<16x1xf32>
    %258 = vector.broadcast %257 : vector<16x1xf32> to vector<16x16xf32>
    %259 = arith.mulf %254, %258 : vector<16x16xf32>
    %cst_194 = arith.constant dense<0.000000e+00> : vector<16x16xf32>
    %260 = tpu.matmul %259, %247, %cst_194 {dimension_numbers = #tpu.dot_dimension_numbers<[1], [0], [0], [1], [0, 0, 1, 1], [], []>} : vector<16x16xf32>, vector<16x16xf32>, vector<16x16xf32> -> vector<16x16xf32>
    %c1_195 = arith.constant 1 : index
    %c1_196 = arith.constant 1 : index
    %c0_197 = arith.constant 0 : index
    %c0_198 = arith.constant 0 : index
    %261 = vector.load %arg11[%c1_195, %c1_196, %c0_197, %c0_198] : memref<2x2x16x32xf32, #tpu.memory_space<vmem>>, vector<1x1x16x32xf32>
    %262 = vector.shape_cast %261 : vector<1x1x16x32xf32> to vector<16x32xf32>
    %cst_199 = arith.constant dense<0.000000e+00> : vector<16x32xf32>
    %263 = tpu.matmul %260, %262, %cst_199 {dimension_numbers = #tpu.dot_dimension_numbers<[1], [0], [0], [1], [0, 0, 1, 1], [], []>} : vector<16x16xf32>, vector<16x32xf32>, vector<16x32xf32> -> vector<16x32xf32>
    %264 = arith.addf %226, %263 : vector<16x32xf32>
    %265 = arith.addf %185, %264 : vector<16x32xf32>
    %c1_200 = arith.constant 1 : index
    %c0_201 = arith.constant 0 : index
    %c0_202 = arith.constant 0 : index
    %266 = vector.load %arg13[%c1_200, %c0_201, %c0_202] : memref<2x1x32xf32, #tpu.memory_space<vmem>>, vector<1x1x32xf32>
    %267 = vector.shape_cast %266 : vector<1x1x32xf32> to vector<1x32xf32>
    %c1_203 = arith.constant 1 : index
    %c0_204 = arith.constant 0 : index
    %c0_205 = arith.constant 0 : index
    %268 = vector.load %arg14[%c1_203, %c0_204, %c0_205] : memref<2x1x32xf32, #tpu.memory_space<vmem>>, vector<1x1x32xf32>
    %269 = vector.shape_cast %268 : vector<1x1x32xf32> to vector<1x32xf32>
    %cst_206 = arith.constant dense<0.000000e+00> : vector<16xf32>
    %270 = vector.multi_reduction <add>, %265, %cst_206 [1] : vector<16x32xf32> to vector<16xf32>
    %271 = vector.shape_cast %270 : vector<16xf32> to vector<16x1xf32>
    %cst_207 = arith.constant 3.200000e+01 : f32
    %272 = vector.broadcast %cst_207 : f32 to vector<16x1xf32>
    %273 = arith.divf %271, %272 : vector<16x1xf32>
    %274 = vector.broadcast %273 : vector<16x1xf32> to vector<16x32xf32>
    %275 = arith.subf %265, %274 : vector<16x32xf32>
    %276 = arith.mulf %275, %275 : vector<16x32xf32>
    %cst_208 = arith.constant dense<0.000000e+00> : vector<16xf32>
    %277 = vector.multi_reduction <add>, %276, %cst_208 [1] : vector<16x32xf32> to vector<16xf32>
    %278 = vector.shape_cast %277 : vector<16xf32> to vector<16x1xf32>
    %cst_209 = arith.constant 3.200000e+01 : f32
    %279 = vector.broadcast %cst_209 : f32 to vector<16x1xf32>
    %280 = arith.divf %278, %279 : vector<16x1xf32>
    %cst_210 = arith.constant 9.99999996E-13 : f32
    %281 = vector.broadcast %cst_210 : f32 to vector<16x1xf32>
    %282 = arith.addf %280, %281 : vector<16x1xf32>
    %283 = math.rsqrt %282 : vector<16x1xf32>
    %284 = vector.broadcast %273 : vector<16x1xf32> to vector<16x32xf32>
    %285 = arith.subf %265, %284 : vector<16x32xf32>
    %286 = vector.broadcast %283 : vector<16x1xf32> to vector<16x32xf32>
    %287 = arith.mulf %285, %286 : vector<16x32xf32>
    %288 = vector.broadcast %267 : vector<1x32xf32> to vector<16x32xf32>
    %289 = arith.mulf %287, %288 : vector<16x32xf32>
    %290 = vector.broadcast %269 : vector<1x32xf32> to vector<16x32xf32>
    %291 = arith.addf %289, %290 : vector<16x32xf32>
    %c1_211 = arith.constant 1 : index
    %c0_212 = arith.constant 0 : index
    %c0_213 = arith.constant 0 : index
    %292 = vector.load %arg15[%c1_211, %c0_212, %c0_213] : memref<2x32x64xf32, #tpu.memory_space<vmem>>, vector<1x32x64xf32>
    %293 = vector.shape_cast %292 : vector<1x32x64xf32> to vector<32x64xf32>
    %cst_214 = arith.constant dense<0.000000e+00> : vector<16x64xf32>
    %294 = tpu.matmul %291, %293, %cst_214 {dimension_numbers = #tpu.dot_dimension_numbers<[1], [0], [0], [1], [0, 0, 1, 1], [], []>} : vector<16x32xf32>, vector<32x64xf32>, vector<16x64xf32> -> vector<16x64xf32>
    %c1_215 = arith.constant 1 : index
    %c0_216 = arith.constant 0 : index
    %c0_217 = arith.constant 0 : index
    %295 = vector.load %arg16[%c1_215, %c0_216, %c0_217] : memref<2x1x64xf32, #tpu.memory_space<vmem>>, vector<1x1x64xf32>
    %296 = vector.shape_cast %295 : vector<1x1x64xf32> to vector<1x64xf32>
    %297 = vector.broadcast %296 : vector<1x64xf32> to vector<16x64xf32>
    %298 = arith.addf %294, %297 : vector<16x64xf32>
    %cst_218 = arith.constant 5.000000e-01 : f32
    %299 = vector.broadcast %cst_218 : f32 to vector<16x64xf32>
    %300 = arith.mulf %299, %298 : vector<16x64xf32>
    %cst_219 = arith.constant 4.471500e-02 : f32
    %301 = vector.broadcast %cst_219 : f32 to vector<16x64xf32>
    %302 = arith.mulf %301, %298 : vector<16x64xf32>
    %303 = arith.mulf %302, %298 : vector<16x64xf32>
    %304 = arith.mulf %303, %298 : vector<16x64xf32>
    %305 = arith.addf %298, %304 : vector<16x64xf32>
    %cst_220 = arith.constant 0.797884583 : f32
    %306 = vector.broadcast %cst_220 : f32 to vector<16x64xf32>
    %307 = arith.mulf %306, %305 : vector<16x64xf32>
    %308 = math.tanh %307 : vector<16x64xf32>
    %cst_221 = arith.constant 1.000000e+00 : f32
    %309 = vector.broadcast %cst_221 : f32 to vector<16x64xf32>
    %310 = arith.addf %309, %308 : vector<16x64xf32>
    %311 = arith.mulf %300, %310 : vector<16x64xf32>
    %c1_222 = arith.constant 1 : index
    %c0_223 = arith.constant 0 : index
    %c0_224 = arith.constant 0 : index
    %312 = vector.load %arg17[%c1_222, %c0_223, %c0_224] : memref<2x64x32xf32, #tpu.memory_space<vmem>>, vector<1x64x32xf32>
    %313 = vector.shape_cast %312 : vector<1x64x32xf32> to vector<64x32xf32>
    %cst_225 = arith.constant dense<0.000000e+00> : vector<16x32xf32>
    %314 = tpu.matmul %311, %313, %cst_225 {dimension_numbers = #tpu.dot_dimension_numbers<[1], [0], [0], [1], [0, 0, 1, 1], [], []>} : vector<16x64xf32>, vector<64x32xf32>, vector<16x32xf32> -> vector<16x32xf32>
    %c1_226 = arith.constant 1 : index
    %c0_227 = arith.constant 0 : index
    %c0_228 = arith.constant 0 : index
    %315 = vector.load %arg18[%c1_226, %c0_227, %c0_228] : memref<2x1x32xf32, #tpu.memory_space<vmem>>, vector<1x1x32xf32>
    %316 = vector.shape_cast %315 : vector<1x1x32xf32> to vector<1x32xf32>
    %317 = vector.broadcast %316 : vector<1x32xf32> to vector<16x32xf32>
    %318 = arith.addf %314, %317 : vector<16x32xf32>
    %319 = arith.addf %291, %318 : vector<16x32xf32>
    %c1_229 = arith.constant 1 : index
    %c0_230 = arith.constant 0 : index
    %c0_231 = arith.constant 0 : index
    %320 = vector.load %arg19[%c1_229, %c0_230, %c0_231] : memref<2x1x32xf32, #tpu.memory_space<vmem>>, vector<1x1x32xf32>
    %321 = vector.shape_cast %320 : vector<1x1x32xf32> to vector<1x32xf32>
    %c1_232 = arith.constant 1 : index
    %c0_233 = arith.constant 0 : index
    %c0_234 = arith.constant 0 : index
    %322 = vector.load %arg20[%c1_232, %c0_233, %c0_234] : memref<2x1x32xf32, #tpu.memory_space<vmem>>, vector<1x1x32xf32>
    %323 = vector.shape_cast %322 : vector<1x1x32xf32> to vector<1x32xf32>
    %cst_235 = arith.constant dense<0.000000e+00> : vector<16xf32>
    %324 = vector.multi_reduction <add>, %319, %cst_235 [1] : vector<16x32xf32> to vector<16xf32>
    %325 = vector.shape_cast %324 : vector<16xf32> to vector<16x1xf32>
    %cst_236 = arith.constant 3.200000e+01 : f32
    %326 = vector.broadcast %cst_236 : f32 to vector<16x1xf32>
    %327 = arith.divf %325, %326 : vector<16x1xf32>
    %328 = vector.broadcast %327 : vector<16x1xf32> to vector<16x32xf32>
    %329 = arith.subf %319, %328 : vector<16x32xf32>
    %330 = arith.mulf %329, %329 : vector<16x32xf32>
    %cst_237 = arith.constant dense<0.000000e+00> : vector<16xf32>
    %331 = vector.multi_reduction <add>, %330, %cst_237 [1] : vector<16x32xf32> to vector<16xf32>
    %332 = vector.shape_cast %331 : vector<16xf32> to vector<16x1xf32>
    %cst_238 = arith.constant 3.200000e+01 : f32
    %333 = vector.broadcast %cst_238 : f32 to vector<16x1xf32>
    %334 = arith.divf %332, %333 : vector<16x1xf32>
    %cst_239 = arith.constant 9.99999996E-13 : f32
    %335 = vector.broadcast %cst_239 : f32 to vector<16x1xf32>
    %336 = arith.addf %334, %335 : vector<16x1xf32>
    %337 = math.rsqrt %336 : vector<16x1xf32>
    %338 = vector.broadcast %327 : vector<16x1xf32> to vector<16x32xf32>
    %339 = arith.subf %319, %338 : vector<16x32xf32>
    %340 = vector.broadcast %337 : vector<16x1xf32> to vector<16x32xf32>
    %341 = arith.mulf %339, %340 : vector<16x32xf32>
    %342 = vector.broadcast %321 : vector<1x32xf32> to vector<16x32xf32>
    %343 = arith.mulf %341, %342 : vector<16x32xf32>
    %344 = vector.broadcast %323 : vector<1x32xf32> to vector<16x32xf32>
    %345 = arith.addf %343, %344 : vector<16x32xf32>
    %346 = vector.extract_strided_slice %345 {offsets = [0, 0], sizes = [8, 32], strides = [1, 1]} : vector<16x32xf32> to vector<8x32xf32>
    %cst_240 = arith.constant dense<0xFF800000> : vector<32xf32>
    %347 = vector.multi_reduction <maximumf>, %346, %cst_240 [0] : vector<8x32xf32> to vector<32xf32>
    %348 = vector.shape_cast %347 : vector<32xf32> to vector<1x32xf32>
    %349 = vector.extract_strided_slice %345 {offsets = [8, 0], sizes = [8, 32], strides = [1, 1]} : vector<16x32xf32> to vector<8x32xf32>
    %cst_241 = arith.constant dense<0xFF800000> : vector<32xf32>
    %350 = vector.multi_reduction <maximumf>, %349, %cst_241 [0] : vector<8x32xf32> to vector<32xf32>
    %351 = vector.shape_cast %350 : vector<32xf32> to vector<1x32xf32>
    %352 = tpu.concatenate %348, %351 in 0 : vector<1x32xf32>, vector<1x32xf32> -> vector<2x32xf32>
    %c0_242 = arith.constant 0 : index
    %c0_243 = arith.constant 0 : index
    %353 = vector.load %arg21[%c0_242, %c0_243] : memref<32x2xf32, #tpu.memory_space<vmem>>, vector<32x2xf32>
    %cst_244 = arith.constant dense<0.000000e+00> : vector<2x2xf32>
    %354 = tpu.matmul %352, %353, %cst_244 {dimension_numbers = #tpu.dot_dimension_numbers<[1], [0], [0], [1], [0, 0, 1, 1], [], []>} : vector<2x32xf32>, vector<32x2xf32>, vector<2x2xf32> -> vector<2x2xf32>
    %c0_245 = arith.constant 0 : index
    %c0_246 = arith.constant 0 : index
    %355 = vector.load %arg22[%c0_245, %c0_246] : memref<1x2xf32, #tpu.memory_space<vmem>>, vector<1x2xf32>
    %356 = vector.broadcast %355 : vector<1x2xf32> to vector<2x2xf32>
    %357 = arith.addf %354, %356 : vector<2x2xf32>
    %c0_247 = arith.constant 0 : index
    %c0_248 = arith.constant 0 : index
    %358 = vector.load %arg23[%c0_247, %c0_248] : memref<2x2xf32, #tpu.memory_space<vmem>>, vector<2x2xf32>
    tpu.vector_store %arg23[%c0_247, %c0_248], %357 {strides = array<i32>} : memref<2x2xf32, #tpu.memory_space<vmem>>, vector<2x2xf32>,
    return
  }
  func.func @transform_0(%arg0: i32) -> (i32, i32) {
    %c0_i32 = arith.constant 0 : i32
    %c0_i32_0 = arith.constant 0 : i32
    %c0_i32_1 = arith.constant 0 : i32
    return %c0_i32, %c0_i32_0 : i32, i32
  }
  func.func @transform_1(%arg0: i32) -> (i32, i32) {
    %c0_i32 = arith.constant 0 : i32
    %c0_i32_0 = arith.constant 0 : i32
    %c0_i32_1 = arith.constant 0 : i32
    return %c0_i32, %c0_i32_0 : i32, i32
  }
  func.func @transform_2(%arg0: i32) -> (i32, i32) {
    %c0_i32 = arith.constant 0 : i32
    %c0_i32_0 = arith.constant 0 : i32
    %c0_i32_1 = arith.constant 0 : i32
    return %c0_i32, %c0_i32_0 : i32, i32
  }
  func.func @transform_3(%arg0: i32) -> (i32, i32) {
    %c0_i32 = arith.constant 0 : i32
    %c0_i32_0 = arith.constant 0 : i32
    %c0_i32_1 = arith.constant 0 : i32
    return %c0_i32, %c0_i32_0 : i32, i32
  }
  func.func @transform_4(%arg0: i32) -> (i32, i32, i32, i32) {
    %c0_i32 = arith.constant 0 : i32
    %c0_i32_0 = arith.constant 0 : i32
    %c0_i32_1 = arith.constant 0 : i32
    %c0_i32_2 = arith.constant 0 : i32
    %c0_i32_3 = arith.constant 0 : i32
    return %c0_i32, %c0_i32_0, %c0_i32_1, %c0_i32_2 : i32, i32, i32, i32
  }
  func.func @transform_5(%arg0: i32) -> (i32, i32, i32, i32) {
    %c0_i32 = arith.constant 0 : i32
    %c0_i32_0 = arith.constant 0 : i32
    %c0_i32_1 = arith.constant 0 : i32
    %c0_i32_2 = arith.constant 0 : i32
    %c0_i32_3 = arith.constant 0 : i32
    return %c0_i32, %c0_i32_0, %c0_i32_1, %c0_i32_2 : i32, i32, i32, i32
  }
  func.func @transform_6(%arg0: i32) -> (i32, i32, i32, i32) {
    %c0_i32 = arith.constant 0 : i32
    %c0_i32_0 = arith.constant 0 : i32
    %c0_i32_1 = arith.constant 0 : i32
    %c0_i32_2 = arith.constant 0 : i32
    %c0_i32_3 = arith.constant 0 : i32
    return %c0_i32, %c0_i32_0, %c0_i32_1, %c0_i32_2 : i32, i32, i32, i32
  }
  func.func @transform_7(%arg0: i32) -> (i32, i32, i32, i32) {
    %c0_i32 = arith.constant 0 : i32
    %c0_i32_0 = arith.constant 0 : i32
    %c0_i32_1 = arith.constant 0 : i32
    %c0_i32_2 = arith.constant 0 : i32
    %c0_i32_3 = arith.constant 0 : i32
    return %c0_i32, %c0_i32_0, %c0_i32_1, %c0_i32_2 : i32, i32, i32, i32
  }
  func.func @transform_8(%arg0: i32) -> (i32, i32, i32, i32) {
    %c0_i32 = arith.constant 0 : i32
    %c0_i32_0 = arith.constant 0 : i32
    %c0_i32_1 = arith.constant 0 : i32
    %c0_i32_2 = arith.constant 0 : i32
    %c0_i32_3 = arith.constant 0 : i32
    return %c0_i32, %c0_i32_0, %c0_i32_1, %c0_i32_2 : i32, i32, i32, i32
  }
  func.func @transform_9(%arg0: i32) -> (i32, i32, i32, i32) {
    %c0_i32 = arith.constant 0 : i32
    %c0_i32_0 = arith.constant 0 : i32
    %c0_i32_1 = arith.constant 0 : i32
    %c0_i32_2 = arith.constant 0 : i32
    %c0_i32_3 = arith.constant 0 : i32
    return %c0_i32, %c0_i32_0, %c0_i32_1, %c0_i32_2 : i32, i32, i32, i32
  }
  func.func @transform_10(%arg0: i32) -> (i32, i32, i32, i32) {
    %c0_i32 = arith.constant 0 : i32
    %c0_i32_0 = arith.constant 0 : i32
    %c0_i32_1 = arith.constant 0 : i32
    %c0_i32_2 = arith.constant 0 : i32
    %c0_i32_3 = arith.constant 0 : i32
    return %c0_i32, %c0_i32_0, %c0_i32_1, %c0_i32_2 : i32, i32, i32, i32
  }
  func.func @transform_11(%arg0: i32) -> (i32, i32, i32) {
    %c0_i32 = arith.constant 0 : i32
    %c0_i32_0 = arith.constant 0 : i32
    %c0_i32_1 = arith.constant 0 : i32
    %c0_i32_2 = arith.constant 0 : i32
    return %c0_i32, %c0_i32_0, %c0_i32_1 : i32, i32, i32
  }
  func.func @transform_12(%arg0: i32) -> (i32, i32, i32) {
    %c0_i32 = arith.constant 0 : i32
    %c0_i32_0 = arith.constant 0 : i32
    %c0_i32_1 = arith.constant 0 : i32
    %c0_i32_2 = arith.constant 0 : i32
    return %c0_i32, %c0_i32_0, %c0_i32_1 : i32, i32, i32
  }
  func.func @transform_13(%arg0: i32) -> (i32, i32, i32) {
    %c0_i32 = arith.constant 0 : i32
    %c0_i32_0 = arith.constant 0 : i32
    %c0_i32_1 = arith.constant 0 : i32
    %c0_i32_2 = arith.constant 0 : i32
    return %c0_i32, %c0_i32_0, %c0_i32_1 : i32, i32, i32
  }
  func.func @transform_14(%arg0: i32) -> (i32, i32, i32) {
    %c0_i32 = arith.constant 0 : i32
    %c0_i32_0 = arith.constant 0 : i32
    %c0_i32_1 = arith.constant 0 : i32
    %c0_i32_2 = arith.constant 0 : i32
    return %c0_i32, %c0_i32_0, %c0_i32_1 : i32, i32, i32
  }
  func.func @transform_15(%arg0: i32) -> (i32, i32, i32) {
    %c0_i32 = arith.constant 0 : i32
    %c0_i32_0 = arith.constant 0 : i32
    %c0_i32_1 = arith.constant 0 : i32
    %c0_i32_2 = arith.constant 0 : i32
    return %c0_i32, %c0_i32_0, %c0_i32_1 : i32, i32, i32
  }
  func.func @transform_16(%arg0: i32) -> (i32, i32, i32) {
    %c0_i32 = arith.constant 0 : i32
    %c0_i32_0 = arith.constant 0 : i32
    %c0_i32_1 = arith.constant 0 : i32
    %c0_i32_2 = arith.constant 0 : i32
    return %c0_i32, %c0_i32_0, %c0_i32_1 : i32, i32, i32
  }
  func.func @transform_17(%arg0: i32) -> (i32, i32, i32) {
    %c0_i32 = arith.constant 0 : i32
    %c0_i32_0 = arith.constant 0 : i32
    %c0_i32_1 = arith.constant 0 : i32
    %c0_i32_2 = arith.constant 0 : i32
    return %c0_i32, %c0_i32_0, %c0_i32_1 : i32, i32, i32
  }
  func.func @transform_18(%arg0: i32) -> (i32, i32, i32) {
    %c0_i32 = arith.constant 0 : i32
    %c0_i32_0 = arith.constant 0 : i32
    %c0_i32_1 = arith.constant 0 : i32
    %c0_i32_2 = arith.constant 0 : i32
    return %c0_i32, %c0_i32_0, %c0_i32_1 : i32, i32, i32
  }
  func.func @transform_19(%arg0: i32) -> (i32, i32, i32) {
    %c0_i32 = arith.constant 0 : i32
    %c0_i32_0 = arith.constant 0 : i32
    %c0_i32_1 = arith.constant 0 : i32
    %c0_i32_2 = arith.constant 0 : i32
    return %c0_i32, %c0_i32_0, %c0_i32_1 : i32, i32, i32
  }
  func.func @transform_20(%arg0: i32) -> (i32, i32) {
    %c0_i32 = arith.constant 0 : i32
    %c0_i32_0 = arith.constant 0 : i32
    %c0_i32_1 = arith.constant 0 : i32
    return %c0_i32, %c0_i32_0 : i32, i32
  }
  func.func @transform_21(%arg0: i32) -> (i32, i32) {
    %c0_i32 = arith.constant 0 : i32
    %c0_i32_0 = arith.constant 0 : i32
    %c0_i32_1 = arith.constant 0 : i32
    return %c0_i32, %c0_i32_0 : i32, i32
  }
  func.func @transform_22(%arg0: i32) -> (i32, i32) {
    %c0_i32 = arith.constant 0 : i32
    %c0_i32_0 = arith.constant 0 : i32
    %c0_i32_1 = arith.constant 0 : i32
    return %c0_i32, %c0_i32_0 : i32, i32
  }
}

</mosaic_0001>

<bundles_post_ra>
// kernel: bert_only_forward.1
= control target key start
LH: loop header
LB: loop body
LE: loop exit
PB: predicated region body
PF: predicated region fallthrough
CT: control target
= control target key end

     0   :  { %s4584_s0 = inlined_call_operand.vmem [shape: f32[16,32], index: 0, kind: input, shape index: {}]   ;;  %s4585_s1 = inlined_call_operand.vmem [shape: f32[16,16], index: 1, kind: input, shape index: {}]   ;;  %s4586_s2 = inlined_call_operand.vmem [shape: f32[1,32], index: 2, kind: input, shape index: {}]   ;;  %s4587_s3 = inlined_call_operand.vmem [shape: f32[1,32], index: 3, kind: input, shape index: {}]   ;;  %s4588_s4 = inlined_call_operand.vmem [shape: f32[2,2,32,16], index: 4, kind: input, shape index: {}]   ;;  %s4589_s5 = inlined_call_operand.vmem [shape: f32[2,2,1,16], index: 5, kind: input, shape index: {}]   ;;  %s4590_s6 = inlined_call_operand.vmem [shape: f32[2,2,32,16], index: 6, kind: input, shape index: {}]   ;;  %s4591_s7 = inlined_call_operand.vmem [shape: f32[2,2,1,16], index: 7, kind: input, shape index: {}]   ;;  %s4592_s8 = inlined_call_operand.vmem [shape: f32[2,2,32,16], index: 8, kind: input, shape index: {}]   ;;  %s4593_s9 = inlined_call_operand.vmem [shape: f32[2,2,1,16], index: 9, kind: input, shape index: {}]   ;;  %s4594_s10 = inlined_call_operand.vmem [shape: f32[2,2,16,32], index: 10, kind: input, shape index: {}]   ;;  %s4595_s11 = inlined_call_operand.vmem [shape: f32[2,1,32], index: 11, kind: input, shape index: {}]   ;;  %s4596_s12 = inlined_call_operand.vmem [shape: f32[2,1,32], index: 12, kind: input, shape index: {}]   ;;  %s4597_s13 = inlined_call_operand.vmem [shape: f32[2,1,32], index: 13, kind: input, shape index: {}]   ;;  %s4598_s14 = inlined_call_operand.vmem [shape: f32[2,32,64], index: 14, kind: input, shape index: {}]   ;;  %s4599_s15 = inlined_call_operand.vmem [shape: f32[2,1,64], index: 15, kind: input, shape index: {}]   ;;  %s4600_s16 = inlined_call_operand.vmem [shape: f32[2,64,32], index: 16, kind: input, shape index: {}]   ;;  %s4601_s17 = inlined_call_operand.vmem [shape: f32[2,1,32], index: 17, kind: input, shape index: {}]   ;;  %s4602_s18 = inlined_call_operand.vmem [shape: f32[2,1,32], index: 18, kind: input, shape index: {}]   ;;  %s4603_s19 = inlined_call_operand.vmem [shape: f32[2,1,32], index: 19, kind: input, shape index: {}]   ;;  %s4604_s20 = inlined_call_operand.vmem [shape: f32[32,2], index: 20, kind: input, shape index: {}]   ;;  %s4605_s21 = inlined_call_operand.vmem [shape: f32[1,2], index: 21, kind: input, shape index: {}]   ;;  %s4606_s22 = inlined_call_operand.hbm [shape: f32[2,2], index: 22, kind: output, shape index: {}]  }
   0x1   :  { %4612 = sst [smem:[#allocation5_spill]] %s4584_s0 }
   0x2   :  { %4613 = sst [smem:[#allocation6_spill]] %s4585_s1 }
   0x3   :  { %4614 = sst [smem:[#allocation7_spill]] %s4586_s2 }
   0x4   :  { %4615 = sst [smem:[#allocation8_spill]] %s4587_s3 }
   0x5   :  { %4616 = sst [smem:[#allocation9_spill]] %s4588_s4 }
   0x6   :  { %4617 = sst [smem:[#allocation10_spill]] %s4589_s5 }
   0x7   :  { %4618 = sst [smem:[#allocation11_spill]] %s4590_s6 }
   0x8   :  { %s4619_s29 = sld [smem:[#allocation5_spill]]  ;;  %vm76_vm0 = vcmask 261120  }
   0xe   :  { %v72_v0 = vld [vmem:[%s4619_s29] sm:$0xff]  ;;  %v73_v1 = vld [vmem:[%s4619_s29 + $0x8] sm:$0xff] }
   0xf   :  { %27 = vsyncpa [#allocation3], 0  ;;  %v77_v2 = vsel %vm76_vm0, %v72_v0, 0.0  ;;  %v80_v3 = vsel %vm76_vm0, %v73_v1, 0.0  ;;  %s4620_s1 = sld [smem:[#allocation9_spill]]  ;;  %s4621_s26 = sld [smem:[#allocation11_spill]] }
  0x10   :  { %78 = vadd.xlane.f32.xlu0 %v77_v2  ;;  %v301_v26 = vld [vmem:[%s4592_s8] sm:$0xff]  ;;  %v302_v27 = vld [vmem:[%s4592_s8 + $0x8] sm:$0xff]  ;;  %s4622_s28 = sld [smem:[#allocation7_spill]]  ;;  %s4623_s4 = sld [smem:[#allocation8_spill]]  ;;  %v303_v43 = vld [vmem:[%s4592_s8 + $0x10] sm:$0xff]  ;;  %vm387_vm1 = vcmask 130048  }
  0x11   :  { %v3648_v28 = vpack.c.bf16 %v302_v27, %v301_v26  ;;  %v304_v44 = vld [vmem:[%s4592_s8 + $0x18] sm:$0xff]  ;;  %v3029_v48 = vld [vmem:[%s4591_s7] ss:$0 sm:$0xff]  ;;  %s4624_s3 = sld [smem:[#allocation10_spill]]  ;;  %vm4129_vm2 = vmpackc.low %vm387_vm1, %vm387_vm1  ;;  %s4627_s0 = sld [smem:[#allocation6_spill]]  ;;  %vm1380_vm3 = vcmask 523264  }
  0x12   :  { %v3652_v47 = vpack.c.bf16 %v304_v44, %v303_v43  ;;  %v3032_v59 = vld [vmem:[%s4593_s9] ss:$0 sm:$0xff]  ;;  %vm3935_vm4 = vmmov 0   ;;  %vm2922_vm5 = vcmask 1040384   ;;  %s3937_s6 = smov [#allocation2]   ;;  %vm3008_vm6 = vcmask 9216  }
  0x14   :  { %81 = vadd.xlane.f32.xlu0 %v80_v3 }
  0x15   :  { %v123_v14 = vld [vmem:[%s4620_s1] sm:$0xff]  ;;  %v124_v15 = vld [vmem:[%s4620_s1 + $0x8] sm:$0xff]  ;;  %v125_v20 = vld [vmem:[%s4620_s1 + $0x10] sm:$0xff] }
  0x16   :  { %v3632_v16 = vpack.c.bf16 %v124_v15, %v123_v14  ;;  %v215_v17 = vld [vmem:[%s4621_s26] sm:$0xff]  ;;  %v216_v18 = vld [vmem:[%s4621_s26 + $0x8] sm:$0xff]  ;;  %v126_v21 = vld [vmem:[%s4620_s1 + $0x18] sm:$0xff] }
  0x17   :  { %v3640_v19 = vpack.c.bf16 %v216_v18, %v215_v17  ;;  %v3636_v22 = vpack.c.bf16 %v126_v21, %v125_v20  ;;  %v217_v23 = vld [vmem:[%s4621_s26 + $0x10] sm:$0xff]  ;;  %v218_v24 = vld [vmem:[%s4621_s26 + $0x18] sm:$0xff]  ;;  %v3024_v36 = vld [vmem:[%s4622_s28] ss:$0 sm:$0xff] }
  0x18   :  { %3633 = vmatprep.subr.bf16.mxu0 %v3632_v16  ;;  %v3644_v25 = vpack.c.bf16 %v218_v24, %v217_v23  ;;  %v3025_v38 = vld [vmem:[%s4623_s4] ss:$0 sm:$0xff]  ;;  %v4145_v2 = vld [vmem:[%s4627_s0 + $0x8] sm:$0xff] }
  0x19   :  { %3635 = vmatpush3.bf16.msra.mxu0 %v3632_v16  ;;  %3641 = vmatprep.subr.bf16.mxu1 %v3640_v19  ;;  %v3026_v49 = vld [vmem:[%s4624_s3] ss:$0 sm:$0xff]  ;;  %v3045_v21 = vld [vmem:[%s4620_s1 + $0x28] sm:$0xff] }
  0x1a   :  { %3643 = vmatpush3.bf16.msra.mxu1 %v3640_v19  ;;  %3637 = vmatprep.subr.bf16.mxu0 %v3636_v22  ;;  %v4150_v3 = vld [vmem:[%s4627_s0] sm:$0xff]  ;;  %v579_v24 = vld [vmem:[%s4594_s10 + $0x8] sm:$0xff] }
  0x1b   :  { %3645 = vmatprep.subr.bf16.mxu1 %v3644_v25  ;;  %v3044_v20 = vld [vmem:[%s4620_s1 + $0x20] sm:$0xff]  ;;  %v3053_v43 = vld [vmem:[%s4621_s26 + $0x28] sm:$0xff] }
  0x1c   :  { %v578_v23 = vld [vmem:[%s4594_s10] sm:$0xff] }
  0x1d   :  { %3639 = vmatpush3.bf16.msra.mxu0 %v3636_v22  ;;  %v3670_v22 = vpack.c.bf16 %v3045_v21, %v3044_v20 }
  0x1e   :  { %3647 = vmatpush3.bf16.msra.mxu1 %v3644_v25  ;;  %3649 = vmatprep.subr.bf16.mxu0 %v3648_v28  ;;  %v3666_v25 = vpack.c.bf16 %v579_v24, %v578_v23  ;;  %v3074_v23 = vld [vmem:[%s4594_s10 + $0x10] sm:$0xff]  ;;  %v3075_v24 = vld [vmem:[%s4594_s10 + $0x18] sm:$0xff] }
  0x9d   :  { %v79_v4 = vpop.xlane.xlu0 %78 }
  0x9e   :  { %v84_v5 = vmul.f32 0.03125, %v79_v4 }
  0xa0   :  { %v86_v6 = vsub.f32 %v72_v0, %v84_v5 }
  0xa1   :  { %v82_v7 = vpop.xlane.xlu0 %81 }
  0xa2   :  { %v85_v8 = vmul.f32 0.03125, %v82_v7  ;;  %v88_v9 = vmul.f32 %v86_v6, %v86_v6 }
  0xa4   :  { %v87_v10 = vsub.f32 %v73_v1, %v85_v8  ;;  %v90_v11 = vsel %vm76_vm0, %v88_v9, 0.0 }
  0xa5   :  { %91 = vadd.xlane.f32.xlu1 %v90_v11 }
  0xa6   :  { %v89_v12 = vmul.f32 %v87_v10, %v87_v10 }
  0xa8   :  { %v93_v13 = vsel %vm76_vm0, %v89_v12, 0.0 }
  0xa9   :  { %94 = vadd.xlane.f32.xlu1 %v93_v13 }
 0x132   :  { %v92_v29 = vpop.xlane.xlu1 %91 }
 0x133   :  { %v96_v30 = vmul.f32 0.03125, %v92_v29  ;;  %v3046_v29 = vld [vmem:[%s4620_s1 + $0x30] sm:$0xff] }
 0x135   :  { %v98_v31 = vadd.f32 1e-12, %v96_v30  ;;  %v3047_v30 = vld [vmem:[%s4620_s1 + $0x38] sm:$0xff] }
 0x136   :  { %v95_v32 = vpop.xlane.xlu1 %94 }
 0x137   :  { %3850 = vrsqrt.f32 %v98_v31  ;;  %v97_v33 = vmul.f32 0.03125, %v95_v32 }
 0x139   :  { %v99_v34 = vadd.f32 1e-12, %v97_v33 }
 0x13b   :  { %3852 = vrsqrt.f32 %v99_v34  ;;  %v3674_v34 = vpack.c.bf16 %v3047_v30, %v3046_v29 }
 0x141   :  { %v3851_v35 = vpop.eup %3850 }
 0x142   :  { %v102_v37 = vmul.f32 %v3851_v35, %v86_v6  ;;  %v3060_v35 = vld [vmem:[%s4592_s8 + $0x20] sm:$0xff] }
 0x144   :  { %v110_v39 = vmul.f32 %v3024_v36, %v102_v37 }
 0x145   :  { %v3853_v40 = vpop.eup %3852 }
 0x146   :  { %v4099_v41 = vadd.f32 %v3025_v38, %v110_v39  ;;  %v103_v42 = vmul.f32 %v3853_v40, %v87_v10  ;;  %v3063_v39 = vld [vmem:[%s4592_s8 + $0x38] sm:$0xff] }
 0x148   :  { %v111_v45 = vmul.f32 %v3024_v36, %v103_v42  ;;  %3353 = vmatprep.mubr.msk.f32.mxu0 %vm76_vm0, %v4099_v41  ;;  %3364 = vmatprep.mubr.msk.f32.mxu1 %vm76_vm0, %v4099_v41  ;;  %v3061_v36 = vld [vmem:[%s4592_s8 + $0x28] sm:$0xff]  ;;  %v3052_v42 = vld [vmem:[%s4621_s26 + $0x20] sm:$0xff] }
 0x149   :  { %v3686_v37 = vpack.c.bf16 %v3061_v36, %v3060_v35  ;;  %v3678_v44 = vpack.c.bf16 %v3053_v43, %v3052_v42 }
 0x14a   :  { %v4111_v46 = vadd.f32 %v3025_v38, %v111_v45  ;;  %v3062_v38 = vld [vmem:[%s4592_s8 + $0x30] sm:$0xff] }
 0x14b   :  { %v3690_v40 = vpack.c.bf16 %v3063_v39, %v3062_v38  ;;  %v3054_v45 = vld [vmem:[%s4621_s26 + $0x30] sm:$0xff] }
 0x14c   :  { %3354 = vmatmul.mubr.msk.f32.vlgmr.msra.gmra.mrb[0].mxu0 %vm76_vm0, %v4111_v46  ;;  %3365 = vmatmul.mubr.msk.f32.vlgmr.msra.gmra.mrb[0].mxu1 %vm76_vm0, %v4111_v46 }
 0x14d   :  { %3651 = vmatpush3.bf16.msra.mxu0 %v3648_v28  ;;  %3375 = vmatprep.mubr.msk.f32.mxu0 %vm76_vm0, %v4099_v41 }
 0x14e   :  { %3653 = vmatprep.subr.bf16.mxu0 %v3652_v47 }
 0x151   :  { %3655 = vmatpush3.bf16.msra.mxu0 %v3652_v47  ;;  %v3055_v47 = vld [vmem:[%s4621_s26 + $0x38] sm:$0xff] }
 0x154   :  { %3376 = vmatmul.mubr.msk.f32.vlgmr.msra.gmra.mrb[2].mxu0 %vm76_vm0, %v4111_v46 }
 0x21f   :  { %v3355_v50 = vpop.f32.mrb[0].mxu0  ;;  %v3366_v51 = vpop.f32.mrb[0].mxu1 }
 0x220   :  { %v298_v52 = vadd.f32 %v3366_v51, %v3029_v48  ;;  %v206_v53 = vpop.f32.mrb[1].mxu0  ;;  %v292_v54 = vpop.f32.mrb[1].mxu1  ;;  %v212_v0 = vadd.f32 %v3355_v50, %v3026_v49  ;;  %v3682_v50 = vpack.c.bf16 %v3055_v47, %v3054_v45  ;;  %v3049_v51 = vld [vmem:[%s4624_s3 + $0x1] ss:$0 sm:$0xff] }
 0x221   :  { %v207_v55 = vadd.f32 %v3026_v49, %v206_v53  ;;  %v293_v56 = vadd.f32 %v3029_v48, %v292_v54 }
 0x223   :  { %v3656_v58 = vpack.c.bf16 %v298_v52, %v293_v56  ;;  %3382 = vmatprep.mubr.msk.f32.mxu1 %vm387_vm1, %v207_v55  ;;  %v3065_v56 = vld [vmem:[%s4593_s9 + $0x1] ss:$0 sm:$0xff] }
 0x225   :  { %3658 = vmatprep.subr.msk.bf16.mxu1 %vm4129_vm2, %v3656_v58 }
 0x226   :  { %3661 = vmatpush3.bf16.xpose.msk.msra.mxu1 %vm4129_vm2, %v3656_v58 }
 0x227   :  { %v3377_v60 = vpop.f32.mrb[2].mxu0  ;;  %3667 = vmatprep.subr.bf16.mxu1 %v3666_v25 }
 0x228   :  { %v384_v61 = vadd.f32 %v3377_v60, %v3032_v59  ;;  %v378_v62 = vpop.f32.mrb[3].mxu0 }
 0x229   :  { %v379_v63 = vadd.f32 %v3032_v59, %v378_v62 }
 0x22b   :  { %v3662_v1 = vpack.c.bf16 %v384_v61, %v379_v63  ;;  %v3057_v63 = vld [vmem:[%s4591_s7 + $0x1] ss:$0 sm:$0xff] }
 0x22d   :  { %3663 = vmatprep.subr.bf16.mxu0 %v3662_v1  ;;  %3383 = vmatmul.mubr.msk.f32.vlgmr.msra.gmra.mrb[2].mxu1 %vm387_vm1, %v212_v0 }
 0x22e   :  { %3665 = vmatpush3.bf16.msra.mxu0 %v3662_v1  ;;  %3669 = vmatpush3.bf16.msra.mxu1 %v3666_v25  ;;  %v3704_v25 = vpack.c.bf16 %v3075_v24, %v3074_v23  ;;  %v1371_v23 = vld [vmem:[%s4600_s16 + $0x30] sm:$0xff]  ;;  %v1372_v24 = vld [vmem:[%s4600_s16 + $0x38] sm:$0xff] }
 0x22f   :  { %3671 = vmatprep.subr.bf16.mxu0 %v3670_v22  ;;  %3679 = vmatprep.subr.bf16.mxu1 %v3678_v44 }
 0x300   :  { %v3384_v4 = vpop.f32.mrb[2].mxu1 }
 0x301   :  { %v472_v5 = vadd.f32 %v3384_v4, %v4145_v2  ;;  %v466_v6 = vpop.f32.mrb[3].mxu1 }
 0x302   :  { %v467_v7 = vadd.f32 %v466_v6, %v4150_v3 }
 0x303   :  { %v478_v8 = vsel %vm387_vm1, %v472_v5, -inf }
 0x304   :  { %479 = vmax.xlane.f32.xlu1 %v478_v8  ;;  %v475_v9 = vsel %vm387_vm1, %v467_v7, -inf }
 0x305   :  { %476 = vmax.xlane.f32.xlu0 %v475_v9 }
 0x391   :  { %v480_v10 = vpop.xlane.xlu1 %479 }
 0x392   :  { %v482_v11 = vsub.f32 %v472_v5, %v480_v10  ;;  %v477_v12 = vpop.xlane.xlu0 %476 }
 0x393   :  { %v481_v13 = vsub.f32 %v467_v7, %v477_v12 }
 0x394   :  { %v485_v14 = vmul.f32 1.442695, %v482_v11 }
 0x395   :  { %v483_v15 = vmul.f32 1.442695, %v481_v13 }
 0x396   :  { %3854 = vpow2.f32 %v485_v14 }
 0x397   :  { %3856 = vpow2.f32 %v483_v15 }
 0x3a0   :  { %v3855_v16 = vpop.eup %3854 }
 0x3a1   :  { %v3857_v17 = vpop.eup %3856  ;;  %v490_v18 = vsel %vm387_vm1, %v3855_v16, 0.0 }
 0x3a2   :  { %491 = vadd.xlane.f32.xlu1 %v490_v18  ;;  %v487_v19 = vsel %vm387_vm1, %v3857_v17, 0.0 }
 0x3a3   :  { %488 = vadd.xlane.f32.xlu0 %v487_v19 }
 0x42f   :  { %v492_v26 = vpop.xlane.xlu1 %491 }
 0x430   :  { %3858 = vrcp.f32 %v492_v26  ;;  %v489_v27 = vpop.xlane.xlu0 %488 }
 0x431   :  { %3860 = vrcp.f32 %v489_v27 }
 0x43a   :  { %v3859_v28 = vpop.eup %3858 }
 0x43b   :  { %v3861_v31 = vpop.eup %3860  ;;  %v496_v33 = vmul.f32 %v3859_v28, %v3855_v16 }
 0x43c   :  { %v495_v32 = vmul.f32 %v3861_v31, %v3857_v17 }
 0x43e   :  { %3389 = vmatprep.mubr.msk.f32.mxu0 %vm387_vm1, %v495_v32 }
 0x43f   :  { %3390 = vmatmul.mubr.msk.f32.vlgmr.msra.gmra.mrb[4].mxu0 %vm387_vm1, %v496_v33 }
 0x440   :  { %3673 = vmatpush3.bf16.msra.mxu0 %v3670_v22  ;;  %3407 = vmatprep.mubr.msk.f32.mxu0 %vm76_vm0, %v4099_v41 }
 0x441   :  { %3675 = vmatprep.subr.bf16.mxu0 %v3674_v34 }
 0x444   :  { %3677 = vmatpush3.bf16.msra.mxu0 %v3674_v34  ;;  %v3043_v34 = vld [vmem:[%s4595_s11] ss:$0 sm:$0xff] }
 0x445   :  { %3687 = vmatprep.subr.bf16.mxu0 %v3686_v37 }
 0x447   :  { %3408 = vmatmul.mubr.msk.f32.vlgmr.msra.gmra.mrb[6].mxu0 %vm76_vm0, %v4111_v46 }
 0x448   :  { %3689 = vmatpush3.bf16.msra.mxu0 %v3686_v37  ;;  %3429 = vmatprep.mubr.msk.f32.mxu0 %vm76_vm0, %v4099_v41 }
 0x449   :  { %3691 = vmatprep.subr.bf16.mxu0 %v3690_v40 }
 0x44c   :  { %3693 = vmatpush3.bf16.msra.mxu0 %v3690_v40 }
 0x44f   :  { %3430 = vmatmul.mubr.msk.f32.vlgmr.msra.gmra.mrb[8].mxu0 %vm76_vm0, %v4111_v46 }
 0x512   :  { %v3391_v48 = vpop.f32.mrb[4].mxu0 }
 0x513   :  { %v569_v49 = vpop.f32.mrb[5].mxu0 }
 0x514   :  { %3396 = vmatprep.mubr.msk.f32.mxu1 %vm387_vm1, %v569_v49 }
 0x515   :  { %3397 = vmatmul.mubr.msk.f32.vlgmr.msra.gmra.mrb[4].mxu1 %vm387_vm1, %v3391_v48 }
 0x516   :  { %3681 = vmatpush3.bf16.msra.mxu1 %v3678_v44  ;;  %3418 = vmatprep.mubr.msk.f32.mxu1 %vm76_vm0, %v4099_v41 }
 0x517   :  { %3683 = vmatprep.subr.bf16.mxu1 %v3682_v50 }
 0x51a   :  { %v3409_v52 = vpop.f32.mrb[6].mxu0  ;;  %3685 = vmatpush3.bf16.msra.mxu1 %v3682_v50 }
 0x51b   :  { %v754_v53 = vadd.f32 %v3409_v52, %v3049_v51  ;;  %v748_v54 = vpop.f32.mrb[7].mxu0 }
 0x51c   :  { %v749_v55 = vadd.f32 %v3049_v51, %v748_v54  ;;  %v1256_v54 = vld [vmem:[%s4598_s14 + $0x8] sm:$0xff] }
 0x51d   :  { %3419 = vmatmul.mubr.msk.f32.vlgmr.msra.gmra.mrb[6].mxu1 %vm76_vm0, %v4111_v46 }
 0x51e   :  { %3436 = vmatprep.mubr.msk.f32.mxu1 %vm387_vm1, %v749_v55 }
 0x522   :  { %v3431_v58 = vpop.f32.mrb[8].mxu0 }
 0x523   :  { %v930_v59 = vadd.f32 %v3431_v58, %v3065_v56  ;;  %v924_v60 = vpop.f32.mrb[9].mxu0  ;;  %v1258_v58 = vld [vmem:[%s4598_s14 + $0x18] sm:$0xff] }
 0x524   :  { %v925_v61 = vadd.f32 %v3065_v56, %v924_v60  ;;  %v1257_v56 = vld [vmem:[%s4598_s14 + $0x10] sm:$0xff] }
 0x526   :  { %v3700_v62 = vpack.c.bf16 %v930_v59, %v925_v61  ;;  %v3712_v59 = vpack.c.bf16 %v1258_v58, %v1257_v56 }
 0x528   :  { %3701 = vmatprep.subr.bf16.mxu0 %v3700_v62 }
 0x529   :  { %3703 = vmatpush3.bf16.msra.mxu0 %v3700_v62 }
 0x5f0   :  { %v3420_v0 = vpop.f32.mrb[6].mxu1 }
 0x5f1   :  { %v842_v1 = vadd.f32 %v3420_v0, %v3057_v63  ;;  %v836_v4 = vpop.f32.mrb[7].mxu1 }
 0x5f2   :  { %v837_v5 = vadd.f32 %v3057_v63, %v836_v4 }
 0x5f4   :  { %v3694_v6 = vpack.c.bf16 %v842_v1, %v837_v5  ;;  %v3078_v5 = vld [vmem:[%s4596_s12] ss:$0 sm:$0xff] }
 0x5f6   :  { %3696 = vmatprep.subr.msk.bf16.mxu1 %vm4129_vm2, %v3694_v6 }
 0x5f7   :  { %3699 = vmatpush3.bf16.xpose.msk.msra.mxu1 %vm4129_vm2, %v3694_v6 }
 0x5f8   :  { %3705 = vmatprep.subr.bf16.mxu1 %v3704_v25 }
 0x5fe   :  { %3437 = vmatmul.mubr.msk.f32.vlgmr.msra.gmra.mrb[8].mxu1 %vm387_vm1, %v754_v53 }
 0x5ff   :  { %3707 = vmatpush3.bf16.msra.mxu1 %v3704_v25  ;;  %v3728_v25 = vpack.c.bf16 %v1372_v24, %v1371_v23 }
 0x6d1   :  { %v3438_v7 = vpop.f32.mrb[8].mxu1 }
 0x6d2   :  { %v1017_v8 = vadd.f32 %v3438_v7, %v4145_v2  ;;  %v1011_v9 = vpop.f32.mrb[9].mxu1 }
 0x6d3   :  { %v1012_v10 = vadd.f32 %v1011_v9, %v4150_v3  ;;  %v3079_v9 = vld [vmem:[%s4597_s13] ss:$0 sm:$0xff] }
 0x6d4   :  { %v1023_v11 = vsel %vm387_vm1, %v1017_v8, -inf }
 0x6d5   :  { %1024 = vmax.xlane.f32.xlu1 %v1023_v11  ;;  %v1020_v12 = vsel %vm387_vm1, %v1012_v10, -inf }
 0x6d6   :  { %1021 = vmax.xlane.f32.xlu0 %v1020_v12 }
 0x762   :  { %v1025_v13 = vpop.xlane.xlu1 %1024 }
 0x763   :  { %v1027_v14 = vsub.f32 %v1017_v8, %v1025_v13  ;;  %v1022_v15 = vpop.xlane.xlu0 %1021 }
 0x764   :  { %v1026_v16 = vsub.f32 %v1012_v10, %v1022_v15  ;;  %v1366_v15 = vld [vmem:[%s4600_s16 + $0x8] sm:$0xff] }
 0x765   :  { %v1030_v17 = vmul.f32 1.442695, %v1027_v14  ;;  %v1365_v14 = vld [vmem:[%s4600_s16] sm:$0xff] }
 0x766   :  { %v1028_v18 = vmul.f32 1.442695, %v1026_v16  ;;  %v3716_v16 = vpack.c.bf16 %v1366_v15, %v1365_v14  ;;  %v3092_v14 = vld [vmem:[%s4620_s1 + $0x58] sm:$0xff] }
 0x767   :  { %3862 = vpow2.f32 %v1030_v17  ;;  %v1367_v17 = vld [vmem:[%s4600_s16 + $0x10] sm:$0xff] }
 0x768   :  { %3864 = vpow2.f32 %v1028_v18  ;;  %v1368_v18 = vld [vmem:[%s4600_s16 + $0x18] sm:$0xff]  ;;  %3717 = vmatprep.subr.bf16.mxu1 %v3716_v16 }
 0x771   :  { %v3863_v19 = vpop.eup %3862 }
 0x772   :  { %v3865_v20 = vpop.eup %3864  ;;  %v1035_v21 = vsel %vm387_vm1, %v3863_v19, 0.0 }
 0x773   :  { %1036 = vadd.xlane.f32.xlu1 %v1035_v21  ;;  %v1032_v22 = vsel %vm387_vm1, %v3865_v20, 0.0  ;;  %v1370_v21 = vld [vmem:[%s4600_s16 + $0x28] sm:$0xff] }
 0x774   :  { %1033 = vadd.xlane.f32.xlu0 %v1032_v22 }
 0x800   :  { %v1037_v26 = vpop.xlane.xlu1 %1036 }
 0x801   :  { %3866 = vrcp.f32 %v1037_v26  ;;  %v1034_v27 = vpop.xlane.xlu0 %1033  ;;  %v3080_v26 = vld [vmem:[%s4599_s15] ss:$0 sm:$0xff] }
 0x802   :  { %3868 = vrcp.f32 %v1034_v27 }
 0x80b   :  { %v3867_v28 = vpop.eup %3866 }
 0x80c   :  { %v3869_v29 = vpop.eup %3868  ;;  %v1041_v31 = vmul.f32 %v3867_v28, %v3863_v19  ;;  %v1369_v19 = vld [vmem:[%s4600_s16 + $0x20] sm:$0xff] }
 0x80d   :  { %v1040_v30 = vmul.f32 %v3869_v29, %v3865_v20  ;;  %v3720_v20 = vpack.c.bf16 %v1368_v18, %v1367_v17  ;;  %v3724_v22 = vpack.c.bf16 %v1370_v21, %v1369_v19  ;;  %v3108_v17 = vld [vmem:[%s4592_s8 + $0x58] sm:$0xff]  ;;  %v3097_v19 = vld [vmem:[%s4621_s26 + $0x40] sm:$0xff] }
 0x80f   :  { %3443 = vmatprep.mubr.msk.f32.mxu0 %vm387_vm1, %v1040_v30 }
 0x810   :  { %3444 = vmatmul.mubr.msk.f32.vlgmr.msra.gmra.mrb[10].mxu0 %vm387_vm1, %v1041_v31 }
 0x8e3   :  { %v3445_v32 = vpop.f32.mrb[10].mxu0 }
 0x8e4   :  { %v1114_v33 = vpop.f32.mrb[11].mxu0 }
 0x8e5   :  { %3450 = vmatprep.mubr.msk.f32.mxu1 %vm387_vm1, %v1114_v33 }
 0x8e6   :  { %3451 = vmatmul.mubr.msk.f32.vlgmr.msra.gmra.mrb[4].mxu1 %vm387_vm1, %v3445_v32 }
 0x8e7   :  { %3719 = vmatpush3.bf16.msra.mxu1 %v3716_v16  ;;  %v3107_v16 = vld [vmem:[%s4592_s8 + $0x50] sm:$0xff] }
 0x8e8   :  { %3721 = vmatprep.subr.bf16.mxu1 %v3720_v20  ;;  %v3752_v18 = vpack.c.bf16 %v3108_v17, %v3107_v16 }
 0x8eb   :  { %3723 = vmatpush3.bf16.msra.mxu1 %v3720_v20  ;;  %v3098_v20 = vld [vmem:[%s4621_s26 + $0x48] sm:$0xff] }
 0x8ec   :  { %3725 = vmatprep.subr.bf16.mxu1 %v3724_v22  ;;  %v3740_v21 = vpack.c.bf16 %v3098_v20, %v3097_v19  ;;  %v3145_v19 = vld [vmem:[%s4593_s9 + $0x3] ss:$0 sm:$0xff] }
 0x8ef   :  { %3727 = vmatpush3.bf16.msra.mxu1 %v3724_v22 }
 0x8f0   :  { %3729 = vmatprep.subr.bf16.mxu1 %v3728_v25 }
 0x8f3   :  { %3731 = vmatpush3.bf16.msra.mxu1 %v3728_v25 }
 0x9b9   :  { %v3452_v35 = vpop.f32.mrb[4].mxu1 }
 0x9ba   :  { %v3838_v36 = vadd.f32 %v3452_v35, %v3043_v34  ;;  %v1198_v37 = vpop.f32.mrb[5].mxu1 }
 0x9bb   :  { %v3839_v38 = vadd.f32 %v3043_v34, %v1198_v37 }
 0x9bc   :  { %v1210_v39 = vadd.f32 %v3838_v36, %v4111_v46 }
 0x9bd   :  { %v1209_v40 = vadd.f32 %v3839_v38, %v4099_v41  ;;  %v1255_v41 = vld [vmem:[%s4598_s14] sm:$0xff] }
 0x9be   :  { %v1216_v42 = vsel %vm76_vm0, %v1210_v39, 0.0  ;;  %v3708_v55 = vpack.c.bf16 %v1256_v54, %v1255_v41 }
 0x9bf   :  { %1217 = vadd.xlane.f32.xlu1 %v1216_v42  ;;  %v1213_v43 = vsel %vm76_vm0, %v1209_v40, 0.0 }
 0x9c0   :  { %1214 = vadd.xlane.f32.xlu0 %v1213_v43  ;;  %3709 = vmatprep.subr.bf16.mxu0 %v3708_v55 }
 0x9c1   :  { %3711 = vmatpush3.bf16.msra.mxu0 %v3708_v55 }
 0x9c2   :  { %3713 = vmatprep.subr.bf16.mxu0 %v3712_v59 }
 0x9c5   :  { %3715 = vmatpush3.bf16.msra.mxu0 %v3712_v59 }
 0xa4c   :  { %v1218_v44 = vpop.xlane.xlu1 %1217 }
 0xa4d   :  { %v1220_v45 = vmul.f32 0.03125, %v1218_v44  ;;  %v1215_v47 = vpop.xlane.xlu0 %1214 }
 0xa4e   :  { %v1219_v48 = vmul.f32 0.03125, %v1215_v47 }
 0xa4f   :  { %v1222_v49 = vsub.f32 %v1210_v39, %v1220_v45 }
 0xa50   :  { %v1221_v50 = vsub.f32 %v1209_v40, %v1219_v48 }
 0xa51   :  { %v1224_v51 = vmul.f32 %v1222_v49, %v1222_v49 }
 0xa52   :  { %v1223_v52 = vmul.f32 %v1221_v50, %v1221_v50 }
 0xa53   :  { %v1228_v53 = vsel %vm76_vm0, %v1224_v51, 0.0  ;;  %v3083_v51 = vld [vmem:[%s4601_s17] ss:$0 sm:$0xff] }
 0xa54   :  { %1229 = vadd.xlane.f32.xlu1 %v1228_v53  ;;  %v1225_v46 = vsel %vm76_vm0, %v1223_v52, 0.0 }
 0xa55   :  { %1226 = vadd.xlane.f32.xlu0 %v1225_v46 }
 0xae1   :  { %v1230_v60 = vpop.xlane.xlu1 %1229 }
 0xae2   :  { %v1232_v61 = vmul.f32 0.03125, %v1230_v60  ;;  %v1227_v62 = vpop.xlane.xlu0 %1226 }
 0xae3   :  { %v1231_v63 = vmul.f32 0.03125, %v1227_v62 }
 0xae4   :  { %v1234_v0 = vadd.f32 1e-12, %v1232_v61 }
 0xae5   :  { %v1233_v1 = vadd.f32 1e-12, %v1231_v63 }
 0xae6   :  { %3870 = vrsqrt.f32 %v1234_v0 }
 0xae7   :  { %3872 = vrsqrt.f32 %v1233_v1 }
 0xaf0   :  { %v3871_v4 = vpop.eup %3870 }
 0xaf1   :  { %v3873_v6 = vpop.eup %3872  ;;  %v1238_v7 = vmul.f32 %v3871_v4, %v1222_v49 }
 0xaf2   :  { %v1237_v8 = vmul.f32 %v3873_v6, %v1221_v50 }
 0xaf3   :  { %v1246_v10 = vmul.f32 %v3078_v5, %v1238_v7  ;;  %v3089_v7 = vld [vmem:[%s4620_s1 + $0x40] sm:$0xff] }
 0xaf4   :  { %v1245_v11 = vmul.f32 %v3078_v5, %v1237_v8  ;;  %v3090_v8 = vld [vmem:[%s4620_s1 + $0x48] sm:$0xff] }
 0xaf5   :  { %v1254_v13 = vadd.f32 %v3079_v9, %v1246_v10  ;;  %v3105_v10 = vld [vmem:[%s4592_s8 + $0x40] sm:$0xff] }
 0xaf6   :  { %v1253_v12 = vadd.f32 %v3079_v9, %v1245_v11  ;;  %v3732_v9 = vpack.c.bf16 %v3090_v8, %v3089_v7  ;;  %v3106_v11 = vld [vmem:[%s4592_s8 + $0x48] sm:$0xff]  ;;  %v3143_v7 = vld [vmem:[%s4592_s8 + $0x78] sm:$0xff] }
 0xaf8   :  { %3461 = vmatprep.mubr.msk.f32.mxu0 %vm76_vm0, %v1253_v12  ;;  %3733 = vmatprep.subr.bf16.mxu0 %v3732_v9 }
 0xaf9   :  { %3462 = vmatmul.mubr.msk.f32.vlgmr.msra.gmra.mrb[12].mxu0 %vm76_vm0, %v1254_v13 }
 0xafa   :  { %3735 = vmatpush3.bf16.msra.mxu0 %v3732_v9 }
 0xbcc   :  { %v3463_v27 = vpop.f32.mrb[12].mxu0 }
 0xbcd   :  { %v1344_v28 = vadd.f32 %v3463_v27, %v3080_v26  ;;  %v1338_v29 = vpop.f32.mrb[13].mxu0 }
 0xbce   :  { %v1339_v30 = vadd.f32 %v3080_v26, %v1338_v29  ;;  %v3086_v29 = vld [vmem:[%s4602_s18] ss:$0 sm:$0xff] }
 0xbcf   :  { %v1350_v31 = vmul.f32 0.044715, %v1344_v28  ;;  %v1348_v48 = vmul.f32 0.5, %v1344_v28 }
 0xbd0   :  { %v1349_v32 = vmul.f32 0.044715, %v1339_v30  ;;  %v1347_v45 = vmul.f32 0.5, %v1339_v30 }
 0xbd1   :  { %v1352_v33 = vmul.f32 %v1350_v31, %v1344_v28 }
 0xbd2   :  { %v1351_v34 = vmul.f32 %v1349_v32, %v1339_v30 }
 0xbd3   :  { %v1354_v35 = vmul.f32 %v1352_v33, %v1344_v28  ;;  %v3087_v33 = vld [vmem:[%s4603_s19] ss:$0 sm:$0xff] }
 0xbd4   :  { %v1353_v36 = vmul.f32 %v1351_v34, %v1339_v30 }
 0xbd5   :  { %v1356_v37 = vadd.f32 %v1354_v35, %v1344_v28 }
 0xbd6   :  { %v1355_v38 = vadd.f32 %v1353_v36, %v1339_v30  ;;  %v3099_v36 = vld [vmem:[%s4621_s26 + $0x50] sm:$0xff] }
 0xbd7   :  { %v1358_v39 = vmul.f32 0.7978846, %v1356_v37  ;;  %v3100_v37 = vld [vmem:[%s4621_s26 + $0x58] sm:$0xff] }
 0xbd8   :  { %v1357_v40 = vmul.f32 0.7978846, %v1355_v38 }
 0xbd9   :  { %3874 = vtanh.f32 %v1358_v39 }
 0xbda   :  { %3876 = vtanh.f32 %v1357_v40  ;;  %v3744_v40 = vpack.c.bf16 %v3100_v37, %v3099_v36  ;;  %v3120_v36 = vld [vmem:[%s4594_s10 + $0x28] sm:$0xff] }
 0xbe3   :  { %v3875_v42 = vpop.eup %3874 }
 0xbe4   :  { %v3877_v43 = vpop.eup %3876  ;;  %v1362_v44 = vadd.f32 1.0, %v3875_v42  ;;  %v3110_v42 = vld [vmem:[%s4593_s9 + $0x2] ss:$0 sm:$0xff] }
 0xbe5   :  { %v1361_v47 = vadd.f32 1.0, %v3877_v43  ;;  %v3094_v43 = vld [vmem:[%s4624_s3 + $0x2] ss:$0 sm:$0xff] }
 0xbe6   :  { %v1364_v50 = vmul.f32 %v1362_v44, %v1348_v48 }
 0xbe7   :  { %v1363_v49 = vmul.f32 %v1361_v47, %v1347_v45 }
 0xbe9   :  { %3480 = vmatprep.mubr.msk.f32.mxu1 %vm1380_vm3, %v1363_v49 }
 0xbea   :  { %3481 = vmatmul.mubr.msk.f32.vlgmr.msra.gmra.mrb[10].mxu1 %vm1380_vm3, %v1364_v50 }
 0xcbd   :  { %v3482_v52 = vpop.f32.mrb[10].mxu1 }
 0xcbe   :  { %v1459_v53 = vadd.f32 %v3482_v52, %v3083_v51  ;;  %v1453_v46 = vpop.f32.mrb[11].mxu1 }
 0xcbf   :  { %v1454_v41 = vadd.f32 %v3083_v51, %v1453_v46 }
 0xcc0   :  { %v1463_v54 = vadd.f32 %v1459_v53, %v1254_v13  ;;  %v3091_v13 = vld [vmem:[%s4620_s1 + $0x50] sm:$0xff]  ;;  %v3102_v53 = vld [vmem:[%s4591_s7 + $0x2] ss:$0 sm:$0xff] }
 0xcc1   :  { %v1462_v55 = vadd.f32 %v1454_v41, %v1253_v12  ;;  %v3748_v12 = vpack.c.bf16 %v3106_v11, %v3105_v10  ;;  %v3736_v15 = vpack.c.bf16 %v3092_v14, %v3091_v13 }
 0xcc2   :  { %v1469_v56 = vsel %vm76_vm0, %v1463_v54, 0.0 }
 0xcc3   :  { %1470 = vadd.xlane.f32.xlu1 %v1469_v56  ;;  %v1466_v58 = vsel %vm76_vm0, %v1462_v55, 0.0  ;;  %3749 = vmatprep.subr.bf16.mxu1 %v3748_v12  ;;  %v3125_v56 = vld [vmem:[%s4620_s1 + $0x68] sm:$0xff] }
 0xcc4   :  { %1467 = vadd.xlane.f32.xlu0 %v1466_v58  ;;  %3751 = vmatpush3.bf16.msra.mxu1 %v3748_v12 }
 0xcc5   :  { %3737 = vmatprep.subr.bf16.mxu0 %v3736_v15  ;;  %3753 = vmatprep.subr.bf16.mxu1 %v3752_v18 }
 0xcc6   :  { %3739 = vmatpush3.bf16.msra.mxu0 %v3736_v15  ;;  %v3129_v15 = vld [vmem:[%s4624_s3 + $0x3] ss:$0 sm:$0xff] }
 0xcc7   :  { %3741 = vmatprep.subr.bf16.mxu0 %v3740_v21 }
 0xcc8   :  { %3755 = vmatpush3.bf16.msra.mxu1 %v3752_v18 }
 0xd50   :  { %v1471_v59 = vpop.xlane.xlu1 %1470 }
 0xd51   :  { %v1473_v60 = vmul.f32 0.03125, %v1471_v59  ;;  %v1468_v61 = vpop.xlane.xlu0 %1467 }
 0xd52   :  { %v1472_v62 = vmul.f32 0.03125, %v1468_v61  ;;  %v3126_v61 = vld [vmem:[%s4620_s1 + $0x70] sm:$0xff] }
 0xd53   :  { %v1475_v63 = vsub.f32 %v1463_v54, %v1473_v60 }
 0xd54   :  { %v1474_v0 = vsub.f32 %v1462_v55, %v1472_v62  ;;  %v3124_v55 = vld [vmem:[%s4620_s1 + $0x60] sm:$0xff]  ;;  %v3127_v62 = vld [vmem:[%s4620_s1 + $0x78] sm:$0xff] }
 0xd55   :  { %v1477_v1 = vmul.f32 %v1475_v63, %v1475_v63  ;;  %v3770_v60 = vpack.c.bf16 %v3125_v56, %v3124_v55  ;;  %v3137_v55 = vld [vmem:[%s4591_s7 + $0x3] ss:$0 sm:$0xff] }
 0xd56   :  { %v1476_v4 = vmul.f32 %v1474_v0, %v1474_v0 }
 0xd57   :  { %v1481_v5 = vsel %vm76_vm0, %v1477_v1, 0.0  ;;  %v3140_v1 = vld [vmem:[%s4592_s8 + $0x60] sm:$0xff] }
 0xd58   :  { %1482 = vadd.xlane.f32.xlu1 %v1481_v5  ;;  %v1478_v6 = vsel %vm76_vm0, %v1476_v4, 0.0  ;;  %v3141_v4 = vld [vmem:[%s4592_s8 + $0x68] sm:$0xff] }
 0xd59   :  { %1479 = vadd.xlane.f32.xlu0 %v1478_v6  ;;  %v3786_v5 = vpack.c.bf16 %v3141_v4, %v3140_v1  ;;  %v3142_v6 = vld [vmem:[%s4592_s8 + $0x70] sm:$0xff] }
 0xd5a   :  { %v3790_v8 = vpack.c.bf16 %v3143_v7, %v3142_v6 }
 0xde5   :  { %v1483_v22 = vpop.xlane.xlu1 %1482 }
 0xde6   :  { %v1485_v23 = vmul.f32 0.03125, %v1483_v22  ;;  %v1480_v24 = vpop.xlane.xlu0 %1479 }
 0xde7   :  { %v1484_v25 = vmul.f32 0.03125, %v1480_v24 }
 0xde8   :  { %v1487_v26 = vadd.f32 1e-12, %v1485_v23 }
 0xde9   :  { %v1486_v27 = vadd.f32 1e-12, %v1484_v25 }
 0xdea   :  { %3878 = vrsqrt.f32 %v1487_v26 }
 0xdeb   :  { %3880 = vrsqrt.f32 %v1486_v27 }
 0xdf4   :  { %v3879_v28 = vpop.eup %3878 }
 0xdf5   :  { %v3881_v30 = vpop.eup %3880  ;;  %v1491_v31 = vmul.f32 %v3879_v28, %v1475_v63 }
 0xdf6   :  { %v1490_v32 = vmul.f32 %v3881_v30, %v1474_v0  ;;  %v3774_v0 = vpack.c.bf16 %v3127_v62, %v3126_v61 }
 0xdf7   :  { %v1499_v34 = vmul.f32 %v3086_v29, %v1491_v31 }
 0xdf8   :  { %v1498_v35 = vmul.f32 %v3086_v29, %v1490_v32 }
 0xdf9   :  { %v4356_v39 = vadd.f32 %v3087_v33, %v1499_v34 }
 0xdfa   :  { %v4354_v38 = vadd.f32 %v3087_v33, %v1498_v35  ;;  %v3119_v35 = vld [vmem:[%s4594_s10 + $0x20] sm:$0xff] }
 0xdfb   :  { %v3766_v37 = vpack.c.bf16 %v3120_v36, %v3119_v35 }
 0xdfc   :  { %3491 = vmatprep.mubr.msk.f32.mxu0 %vm76_vm0, %v4354_v38  ;;  %3513 = vmatprep.mubr.msk.f32.mxu1 %vm76_vm0, %v4354_v38 }
 0xdfd   :  { %3492 = vmatmul.mubr.msk.f32.vlgmr.msra.gmra.mrb[14].mxu0 %vm76_vm0, %v4356_v39  ;;  %3514 = vmatmul.mubr.msk.f32.vlgmr.msra.gmra.mrb[12].mxu1 %vm76_vm0, %v4356_v39 }
 0xdfe   :  { %3743 = vmatpush3.bf16.msra.mxu0 %v3740_v21  ;;  %3502 = vmatprep.mubr.msk.f32.mxu0 %vm76_vm0, %v4354_v38 }
 0xdff   :  { %3745 = vmatprep.subr.bf16.mxu0 %v3744_v40 }
 0xe02   :  { %3747 = vmatpush3.bf16.msra.mxu0 %v3744_v40 }
 0xe05   :  { %3503 = vmatmul.mubr.msk.f32.vlgmr.msra.gmra.mrb[16].mxu0 %vm76_vm0, %v4356_v39 }
 0xed0   :  { %v3493_v44 = vpop.f32.mrb[14].mxu0  ;;  %v3515_v45 = vpop.f32.mrb[12].mxu1 }
 0xed1   :  { %v1777_v47 = vadd.f32 %v3515_v45, %v3110_v42  ;;  %v1595_v48 = vpop.f32.mrb[15].mxu0  ;;  %v1771_v49 = vpop.f32.mrb[13].mxu1  ;;  %v1601_v63 = vadd.f32 %v3493_v44, %v3094_v43 }
 0xed2   :  { %v1596_v50 = vadd.f32 %v3094_v43, %v1595_v48  ;;  %v1772_v51 = vadd.f32 %v3110_v42, %v1771_v49  ;;  %v3132_v48 = vld [vmem:[%s4621_s26 + $0x60] sm:$0xff]  ;;  %v3133_v49 = vld [vmem:[%s4621_s26 + $0x68] sm:$0xff] }
 0xed4   :  { %v3762_v52 = vpack.c.bf16 %v1777_v47, %v1772_v51  ;;  %3520 = vmatprep.mubr.msk.f32.mxu0 %vm387_vm1, %v1596_v50  ;;  %v3778_v50 = vpack.c.bf16 %v3133_v49, %v3132_v48  ;;  %v3134_v51 = vld [vmem:[%s4621_s26 + $0x70] sm:$0xff]  ;;  %v3165_v49 = vld [vmem:[%s4598_s14 + $0x38] sm:$0xff] }
 0xed5   :  { %v3164_v48 = vld [vmem:[%s4598_s14 + $0x30] sm:$0xff] }
 0xed6   :  { %3763 = vmatprep.subr.bf16.mxu1 %v3762_v52 }
 0xed7   :  { %3765 = vmatpush3.bf16.msra.mxu1 %v3762_v52  ;;  %v3135_v52 = vld [vmem:[%s4621_s26 + $0x78] sm:$0xff] }
 0xed8   :  { %v3504_v46 = vpop.f32.mrb[16].mxu0  ;;  %3767 = vmatprep.subr.bf16.mxu1 %v3766_v37 }
 0xed9   :  { %v1689_v41 = vadd.f32 %v3504_v46, %v3102_v53  ;;  %v1683_v54 = vpop.f32.mrb[17].mxu0 }
 0xeda   :  { %v1684_v58 = vadd.f32 %v3102_v53, %v1683_v54 }
 0xedc   :  { %v3756_v59 = vpack.c.bf16 %v1689_v41, %v1684_v58  ;;  %v3782_v41 = vpack.c.bf16 %v3135_v52, %v3134_v51 }
 0xede   :  { %3758 = vmatprep.subr.msk.bf16.mxu0 %vm4129_vm2, %v3756_v59 }
 0xedf   :  { %3761 = vmatpush3.bf16.xpose.msk.msra.mxu0 %vm4129_vm2, %v3756_v59 }
 0xee0   :  { %3771 = vmatprep.subr.bf16.mxu0 %v3770_v60 }
 0xee6   :  { %3521 = vmatmul.mubr.msk.f32.vlgmr.msra.gmra.mrb[18].mxu0 %vm387_vm1, %v1601_v63 }
 0xee7   :  { %3773 = vmatpush3.bf16.msra.mxu0 %v3770_v60  ;;  %3545 = vmatprep.mubr.msk.f32.mxu0 %vm76_vm0, %v4354_v38 }
 0xee8   :  { %3775 = vmatprep.subr.bf16.mxu0 %v3774_v0 }
 0xeeb   :  { %3777 = vmatpush3.bf16.msra.mxu0 %v3774_v0 }
 0xeec   :  { %3787 = vmatprep.subr.bf16.mxu0 %v3786_v5 }
 0xeee   :  { %3546 = vmatmul.mubr.msk.f32.vlgmr.msra.gmra.mrb[20].mxu0 %vm76_vm0, %v4356_v39 }
 0xeef   :  { %3789 = vmatpush3.bf16.msra.mxu0 %v3786_v5  ;;  %3567 = vmatprep.mubr.msk.f32.mxu0 %vm76_vm0, %v4354_v38 }
 0xef0   :  { %3791 = vmatprep.subr.bf16.mxu0 %v3790_v8 }
 0xef3   :  { %3793 = vmatpush3.bf16.msra.mxu0 %v3790_v8 }
 0xef6   :  { %3568 = vmatmul.mubr.msk.f32.vlgmr.msra.gmra.mrb[22].mxu0 %vm76_vm0, %v4356_v39 }
 0xfb9   :  { %v3522_v9 = vpop.f32.mrb[18].mxu0 }
 0xfba   :  { %v1864_v10 = vadd.f32 %v3522_v9, %v4145_v2  ;;  %v1858_v11 = vpop.f32.mrb[19].mxu0 }
 0xfbb   :  { %v1859_v12 = vadd.f32 %v1858_v11, %v4150_v3 }
 0xfbc   :  { %v1870_v13 = vsel %vm387_vm1, %v1864_v10, -inf }
 0xfbd   :  { %1871 = vmax.xlane.f32.xlu1 %v1870_v13  ;;  %v1867_v14 = vsel %vm387_vm1, %v1859_v12, -inf  ;;  %v3154_v13 = vld [vmem:[%s4594_s10 + $0x30] sm:$0xff] }
 0xfbe   :  { %1868 = vmax.xlane.f32.xlu0 %v1867_v14  ;;  %v3155_v14 = vld [vmem:[%s4594_s10 + $0x38] sm:$0xff] }
 0xfc1   :  { %v3547_v16 = vpop.f32.mrb[20].mxu0 }
 0xfc2   :  { %v4424_v17 = vadd.f32 %v3547_v16, %v3129_v15  ;;  %v2141_v18 = vpop.f32.mrb[21].mxu0 }
 0xfc3   :  { %v2142_v54 = vadd.f32 %v3129_v15, %v2141_v18  ;;  %v3804_v15 = vpack.c.bf16 %v3155_v14, %v3154_v13  ;;  %v3167_v13 = vld [vmem:[%s4599_s15 + $0x1] ss:$0 sm:$0xff] }
 0xfc9   :  { %v3569_v20 = vpop.f32.mrb[22].mxu0 }
 0xfca   :  { %v2323_v21 = vadd.f32 %v3569_v20, %v3145_v19  ;;  %v2317_v22 = vpop.f32.mrb[23].mxu0 }
 0xfcb   :  { %v2318_v23 = vadd.f32 %v3145_v19, %v2317_v22 }
 0xfcd   :  { %v3800_v24 = vpack.c.bf16 %v2323_v21, %v2318_v23 }
 0xfcf   :  { %3801 = vmatprep.subr.bf16.mxu0 %v3800_v24 }
 0xfd0   :  { %3803 = vmatpush3.bf16.msra.mxu0 %v3800_v24  ;;  %v3123_v24 = vld [vmem:[%s4595_s11 + $0x1] ss:$0 sm:$0xff] }
0x104a   :  { %v1872_v25 = vpop.xlane.xlu1 %1871 }
0x104b   :  { %v1874_v26 = vsub.f32 %v1864_v10, %v1872_v25  ;;  %v1869_v27 = vpop.xlane.xlu0 %1868 }
0x104c   :  { %v1873_v28 = vsub.f32 %v1859_v12, %v1869_v27 }
0x104d   :  { %v1877_v29 = vmul.f32 1.442695, %v1874_v26 }
0x104e   :  { %v1875_v30 = vmul.f32 1.442695, %v1873_v28 }
0x104f   :  { %3882 = vpow2.f32 %v1877_v29 }
0x1050   :  { %3884 = vpow2.f32 %v1875_v30 }
0x1059   :  { %v3883_v31 = vpop.eup %3882 }
0x105a   :  { %v3885_v32 = vpop.eup %3884  ;;  %v1882_v33 = vsel %vm387_vm1, %v3883_v31, 0.0 }
0x105b   :  { %1883 = vadd.xlane.f32.xlu1 %v1882_v33  ;;  %v1879_v34 = vsel %vm387_vm1, %v3885_v32, 0.0 }
0x105c   :  { %1880 = vadd.xlane.f32.xlu0 %v1879_v34 }
0x10e8   :  { %v1884_v40 = vpop.xlane.xlu1 %1883 }
0x10e9   :  { %3886 = vrcp.f32 %v1884_v40  ;;  %v1881_v42 = vpop.xlane.xlu0 %1880 }
0x10ea   :  { %3888 = vrcp.f32 %v1881_v42 }
0x10f3   :  { %v3887_v43 = vpop.eup %3886 }
0x10f4   :  { %v3889_v44 = vpop.eup %3888  ;;  %v1888_v47 = vmul.f32 %v3887_v43, %v3883_v31 }
0x10f5   :  { %v1887_v45 = vmul.f32 %v3889_v44, %v3885_v32 }
0x10f7   :  { %3527 = vmatprep.mubr.msk.f32.mxu1 %vm387_vm1, %v1887_v45  ;;  %v3163_v45 = vld [vmem:[%s4598_s14 + $0x28] sm:$0xff] }
0x10f8   :  { %3528 = vmatmul.mubr.msk.f32.vlgmr.msra.gmra.mrb[14].mxu1 %vm387_vm1, %v1888_v47 }
0x10f9   :  { %3769 = vmatpush3.bf16.msra.mxu1 %v3766_v37 }
0x10fa   :  { %3779 = vmatprep.subr.bf16.mxu1 %v3778_v50 }
0x11cb   :  { %v3529_v53 = vpop.f32.mrb[14].mxu1 }
0x11cc   :  { %v1961_v46 = vpop.f32.mrb[15].mxu1 }
0x11cd   :  { %3534 = vmatprep.mubr.msk.f32.mxu1 %vm387_vm1, %v1961_v46 }
0x11ce   :  { %3535 = vmatmul.mubr.msk.f32.vlgmr.msra.gmra.mrb[16].mxu1 %vm387_vm1, %v3529_v53 }
0x11cf   :  { %3781 = vmatpush3.bf16.msra.mxu1 %v3778_v50  ;;  %3556 = vmatprep.mubr.msk.f32.mxu1 %vm76_vm0, %v4354_v38  ;;  %v3812_v50 = vpack.c.bf16 %v3165_v49, %v3164_v48 }
0x11d0   :  { %3783 = vmatprep.subr.bf16.mxu1 %v3782_v41 }
0x11d3   :  { %3785 = vmatpush3.bf16.msra.mxu1 %v3782_v41 }
0x11d6   :  { %3557 = vmatmul.mubr.msk.f32.vlgmr.msra.gmra.mrb[18].mxu1 %vm76_vm0, %v4356_v39 }
0x11d7   :  { %3574 = vmatprep.mubr.msk.f32.mxu1 %vm387_vm1, %v2142_v54 }
0x12a9   :  { %v3558_v56 = vpop.f32.mrb[18].mxu1 }
0x12aa   :  { %v2235_v58 = vadd.f32 %v3558_v56, %v3137_v55  ;;  %v2229_v59 = vpop.f32.mrb[19].mxu1  ;;  %v3160_v56 = vld [vmem:[%s4596_s12 + $0x1] ss:$0 sm:$0xff] }
0x12ab   :  { %v2230_v60 = vadd.f32 %v3137_v55, %v2229_v59 }
0x12ad   :  { %v3794_v61 = vpack.c.bf16 %v2235_v58, %v2230_v60 }
0x12af   :  { %3796 = vmatprep.subr.msk.bf16.mxu1 %vm4129_vm2, %v3794_v61 }
0x12b0   :  { %3799 = vmatpush3.bf16.xpose.msk.msra.mxu1 %vm4129_vm2, %v3794_v61  ;;  %v3161_v61 = vld [vmem:[%s4597_s13 + $0x1] ss:$0 sm:$0xff]  ;;  %s3016_s13 = sshll.u32 %s3937_s6, 4  ;;  %s3017_s13 = int_to_ptr.vmem [resolvable:$true] %s3016_s13 }
0x12b1   :  { %3805 = vmatprep.subr.bf16.mxu1 %v3804_v15  ;;  %s3910_s25 = scalar_lea.vmem %s3017_s13, 32  ;;  %p3915_p1 = scmp.lt.s32.totalorder %s3017_s13, %s3017_s13 }
0x12b2   :  { %p3911_p0 = scmp.ne.s32.totalorder %s3017_s13, %s3910_s25  ;;  %p3916_p2 = scmp.lt.s32.totalorder %s3910_s25, %s3910_s25 }
0x12b4   :  { %p3917_p3 = por %p3916_p2, %p3915_p1 }
0x12b6   :  { %p3918_p4 = pnand %p3917_p3, %p3911_p0 }
0x12b7   :  { %3575 = vmatmul.mubr.msk.f32.vlgmr.msra.gmra.mrb[20].mxu1 %vm387_vm1, %v4424_v17 }
0x12b8   :  { %3807 = vmatpush3.bf16.msra.mxu1 %v3804_v15 }
0x138a   :  { %v3576_v62 = vpop.f32.mrb[20].mxu1 }
0x138b   :  { %v2410_v63 = vadd.f32 %v3576_v62, %v4145_v2  ;;  %v2404_v0 = vpop.f32.mrb[21].mxu1 }
0x138c   :  { %v2405_v1 = vadd.f32 %v2404_v0, %v4150_v3 }
0x138d   :  { %v2416_v4 = vsel %vm387_vm1, %v2410_v63, -inf }
0x138e   :  { %2417 = vmax.xlane.f32.xlu1 %v2416_v4  ;;  %v2413_v5 = vsel %vm387_vm1, %v2405_v1, -inf  ;;  %v3170_v4 = vld [vmem:[%s4600_s16 + $0x40] sm:$0xff] }
0x138f   :  { %2414 = vmax.xlane.f32.xlu0 %v2413_v5  ;;  %v3171_v5 = vld [vmem:[%s4600_s16 + $0x48] sm:$0xff] }
0x141b   :  { %v2418_v6 = vpop.xlane.xlu1 %2417 }
0x141c   :  { %v2420_v7 = vsub.f32 %v2410_v63, %v2418_v6  ;;  %v2415_v8 = vpop.xlane.xlu0 %2414  ;;  %v3816_v6 = vpack.c.bf16 %v3171_v5, %v3170_v4 }
0x141d   :  { %v2419_v57 = vsub.f32 %v2405_v1, %v2415_v8  ;;  %v3173_v8 = vld [vmem:[%s4600_s16 + $0x58] sm:$0xff] }
0x141e   :  { %v2423_v9 = vmul.f32 1.442695, %v2420_v7  ;;  %v3172_v7 = vld [vmem:[%s4600_s16 + $0x50] sm:$0xff]  ;;  %3817 = vmatprep.subr.bf16.mxu1 %v3816_v6 }
0x141f   :  { %v2421_v10 = vmul.f32 1.442695, %v2419_v57  ;;  %v3174_v57 = vld [vmem:[%s4600_s16 + $0x60] sm:$0xff] }
0x1420   :  { %3890 = vpow2.f32 %v2423_v9  ;;  %v3820_v9 = vpack.c.bf16 %v3173_v8, %v3172_v7 }
0x1421   :  { %3892 = vpow2.f32 %v2421_v10  ;;  %v3175_v10 = vld [vmem:[%s4600_s16 + $0x68] sm:$0xff] }
0x142a   :  { %v3891_v11 = vpop.eup %3890 }
0x142b   :  { %v3893_v12 = vpop.eup %3892  ;;  %v2428_v2 = vsel %vm387_vm1, %v3891_v11, 0.0 }
0x142c   :  { %2429 = vadd.xlane.f32.xlu1 %v2428_v2  ;;  %v2425_v3 = vsel %vm387_vm1, %v3893_v12, 0.0  ;;  %v3177_v2 = vld [vmem:[%s4600_s16 + $0x78] sm:$0xff] }
0x142d   :  { %2426 = vadd.xlane.f32.xlu0 %v2425_v3 }
0x14b9   :  { %v2430_v16 = vpop.xlane.xlu1 %2429 }
0x14ba   :  { %3894 = vrcp.f32 %v2430_v16  ;;  %v2427_v17 = vpop.xlane.xlu0 %2426 }
0x14bb   :  { %3896 = vrcp.f32 %v2427_v17 }
0x14c4   :  { %v3895_v18 = vpop.eup %3894 }
0x14c5   :  { %v3897_v19 = vpop.eup %3896  ;;  %v2434_v21 = vmul.f32 %v3895_v18, %v3891_v11  ;;  %v3824_v11 = vpack.c.bf16 %v3175_v10, %v3174_v57  ;;  %v3184_v57 = vld [vmem:[%s4602_s18 + $0x1] ss:$0 sm:$0xff] }
0x14c6   :  { %v2433_v20 = vmul.f32 %v3897_v19, %v3893_v12  ;;  %v3176_v12 = vld [vmem:[%s4600_s16 + $0x70] sm:$0xff] }
0x14c7   :  { %v3828_v3 = vpack.c.bf16 %v3177_v2, %v3176_v12 }
0x14c8   :  { %3581 = vmatprep.mubr.msk.f32.mxu0 %vm387_vm1, %v2433_v20 }
0x14c9   :  { %3582 = vmatmul.mubr.msk.f32.vlgmr.msra.gmra.mrb[24].mxu0 %vm387_vm1, %v2434_v21 }
0x159c   :  { %v3583_v22 = vpop.f32.mrb[24].mxu0 }
0x159d   :  { %v2507_v23 = vpop.f32.mrb[25].mxu0 }
0x159e   :  { %3588 = vmatprep.mubr.msk.f32.mxu1 %vm387_vm1, %v2507_v23 }
0x159f   :  { %3589 = vmatmul.mubr.msk.f32.vlgmr.msra.gmra.mrb[16].mxu1 %vm387_vm1, %v3583_v22 }
0x15a0   :  { %3819 = vmatpush3.bf16.msra.mxu1 %v3816_v6 }
0x15a1   :  { %3821 = vmatprep.subr.bf16.mxu1 %v3820_v9 }
0x15a4   :  { %3823 = vmatpush3.bf16.msra.mxu1 %v3820_v9 }
0x15a5   :  { %3825 = vmatprep.subr.bf16.mxu1 %v3824_v11 }
0x15a8   :  { %3827 = vmatpush3.bf16.msra.mxu1 %v3824_v11  ;;  %v3185_v11 = vld [vmem:[%s4603_s19 + $0x1] ss:$0 sm:$0xff] }
0x15a9   :  { %3829 = vmatprep.subr.bf16.mxu1 %v3828_v3 }
0x15ac   :  { %3831 = vmatpush3.bf16.msra.mxu1 %v3828_v3 }
0x1672   :  { %v3590_v25 = vpop.f32.mrb[16].mxu1 }
0x1673   :  { %v3840_v26 = vadd.f32 %v3590_v25, %v3123_v24  ;;  %v2591_v27 = vpop.f32.mrb[17].mxu1 }
0x1674   :  { %v3841_v28 = vadd.f32 %v3123_v24, %v2591_v27 }
0x1675   :  { %v2603_v29 = vadd.f32 %v3840_v26, %v4356_v39 }
0x1676   :  { %v2602_v30 = vadd.f32 %v3841_v28, %v4354_v38  ;;  %v3162_v38 = vld [vmem:[%s4598_s14 + $0x20] sm:$0xff] }
0x1677   :  { %v2611_v31 = vsel %vm76_vm0, %v2603_v29, 0.0  ;;  %v3808_v47 = vpack.c.bf16 %v3163_v45, %v3162_v38 }
0x1678   :  { %2612 = vadd.xlane.f32.xlu1 %v2611_v31  ;;  %v2608_v32 = vsel %vm76_vm0, %v2602_v30, 0.0 }
0x1679   :  { %2609 = vadd.xlane.f32.xlu0 %v2608_v32  ;;  %3809 = vmatprep.subr.bf16.mxu0 %v3808_v47 }
0x167a   :  { %3811 = vmatpush3.bf16.msra.mxu0 %v3808_v47 }
0x167b   :  { %3813 = vmatprep.subr.bf16.mxu0 %v3812_v50 }
0x167e   :  { %3815 = vmatpush3.bf16.msra.mxu0 %v3812_v50 }
0x1705   :  { %v2613_v33 = vpop.xlane.xlu1 %2612 }
0x1706   :  { %v2615_v34 = vmul.f32 0.03125, %v2613_v33  ;;  %v2610_v35 = vpop.xlane.xlu0 %2609 }
0x1707   :  { %v2614_v36 = vmul.f32 0.03125, %v2610_v35 }
0x1708   :  { %v2617_v37 = vsub.f32 %v2603_v29, %v2615_v34 }
0x1709   :  { %v2616_v40 = vsub.f32 %v2602_v30, %v2614_v36  ;;  %v3179_v36 = vld [vmem:[%s4601_s17 + $0x1] ss:$0 sm:$0xff] }
0x170a   :  { %v2619_v42 = vmul.f32 %v2617_v37, %v2617_v37 }
0x170b   :  { %v2618_v43 = vmul.f32 %v2616_v40, %v2616_v40 }
0x170c   :  { %v2623_v44 = vsel %vm76_vm0, %v2619_v42, 0.0 }
0x170d   :  { %2624 = vadd.xlane.f32.xlu1 %v2623_v44  ;;  %v2620_v39 = vsel %vm76_vm0, %v2618_v43, 0.0 }
0x170e   :  { %2621 = vadd.xlane.f32.xlu0 %v2620_v39 }
0x179a   :  { %v2625_v51 = vpop.xlane.xlu1 %2624 }
0x179b   :  { %v2627_v52 = vmul.f32 0.03125, %v2625_v51  ;;  %v2622_v53 = vpop.xlane.xlu0 %2621 }
0x179c   :  { %v2626_v46 = vmul.f32 0.03125, %v2622_v53 }
0x179d   :  { %v2629_v41 = vadd.f32 1e-12, %v2627_v52 }
0x179e   :  { %v2628_v54 = vadd.f32 1e-12, %v2626_v46 }
0x179f   :  { %3898 = vrsqrt.f32 %v2629_v41 }
0x17a0   :  { %3900 = vrsqrt.f32 %v2628_v54 }
0x17a9   :  { %v3899_v55 = vpop.eup %3898 }
0x17aa   :  { %v3901_v58 = vpop.eup %3900  ;;  %v2633_v59 = vmul.f32 %v3899_v55, %v2617_v37  ;;  %v2924_v55 = vld [vmem:[%s4604_s20] sm:$0xff] }
0x17ab   :  { %v2632_v60 = vmul.f32 %v3901_v58, %v2616_v40  ;;  %v2926_v58 = vld [vmem:[%s4604_s20 + $0x10] sm:$0xff] }
0x17ac   :  { %v2641_v62 = vmul.f32 %v3160_v56, %v2633_v59  ;;  %v3934_v59 = vmov 0.0|0.0  }
0x17ad   :  { %v2640_v63 = vmul.f32 %v3160_v56, %v2632_v60  ;;  %v2925_v56 = vld [vmem:[%s4604_s20 + $0x8] sm:$0xff]  ;;  %3832 = vmatprep.subr.bf16.mxu0 %v3934_v59 }
0x17ae   :  { %v2649_v1 = vadd.f32 %v3161_v61, %v2641_v62  ;;  %v3833_v60 = vpack.c.bf16 %v2925_v56, %v2924_v55  ;;  %v3936_v62 = vmov 0.0  }
0x17af   :  { %v2648_v0 = vadd.f32 %v3161_v61, %v2640_v63  ;;  %v2927_v61 = vld [vmem:[%s4604_s20 + $0x18] sm:$0xff] }
0x17b0   :  { %v3836_v63 = vpack.c.bf16 %v2927_v61, %v2926_v58 }
0x17b1   :  { %3599 = vmatprep.mubr.msk.f32.mxu0 %vm76_vm0, %v2648_v0 }
0x17b2   :  { %3600 = vmatmul.mubr.msk.f32.vlgmr.msra.gmra.mrb[26].mxu0 %vm76_vm0, %v2649_v1 }
0x17b3   :  { %3629 = vmatprep.mubr.msk.f32.mxu0 %vm3935_vm4, %v3936_v62  ;;  %3834 = vmatpush3.bf16.msra.mxu0 %v3833_v60 }
0x17b4   :  { %3835 = vmatprep.subr.bf16.mxu0 %v3934_v59 }
0x17b7   :  { %3837 = vmatpush3.bf16.msra.mxu0 %v3836_v63 }
0x1885   :  { %v3601_v14 = vpop.f32.mrb[26].mxu0 }
0x1886   :  { %v2741_v15 = vadd.f32 %v3601_v14, %v3167_v13  ;;  %v2735_v16 = vpop.f32.mrb[27].mxu0 }
0x1887   :  { %v2736_v17 = vadd.f32 %v3167_v13, %v2735_v16 }
0x1888   :  { %v2747_v18 = vmul.f32 0.044715, %v2741_v15  ;;  %v2745_v33 = vmul.f32 0.5, %v2741_v15 }
0x1889   :  { %v2746_v19 = vmul.f32 0.044715, %v2736_v17  ;;  %v2744_v31 = vmul.f32 0.5, %v2736_v17 }
0x188a   :  { %v2749_v20 = vmul.f32 %v2747_v18, %v2741_v15 }
0x188b   :  { %v2748_v21 = vmul.f32 %v2746_v19, %v2736_v17 }
0x188c   :  { %v2751_v22 = vmul.f32 %v2749_v20, %v2741_v15 }
0x188d   :  { %v2750_v23 = vmul.f32 %v2748_v21, %v2736_v17 }
0x188e   :  { %v2753_v24 = vadd.f32 %v2751_v22, %v2741_v15 }
0x188f   :  { %v2752_v25 = vadd.f32 %v2750_v23, %v2736_v17 }
0x1890   :  { %v2755_v26 = vmul.f32 0.7978846, %v2753_v24 }
0x1891   :  { %v2754_v27 = vmul.f32 0.7978846, %v2752_v25 }
0x1892   :  { %3902 = vtanh.f32 %v2755_v26 }
0x1893   :  { %3904 = vtanh.f32 %v2754_v27 }
0x189c   :  { %v3903_v28 = vpop.eup %3902 }
0x189d   :  { %v3905_v29 = vpop.eup %3904  ;;  %v2759_v30 = vadd.f32 1.0, %v3903_v28 }
0x189e   :  { %v2758_v32 = vadd.f32 1.0, %v3905_v29 }
0x189f   :  { %v2761_v35 = vmul.f32 %v2759_v30, %v2745_v33  ;;  %v3186_v30 = vld [vmem:[%s4605_s21] ss:$0 sm:$0xff] }
0x18a0   :  { %v2760_v34 = vmul.f32 %v2758_v32, %v2744_v31 }
0x18a2   :  { %3618 = vmatprep.mubr.msk.f32.mxu1 %vm1380_vm3, %v2760_v34 }
0x18a3   :  { %3619 = vmatmul.mubr.msk.f32.vlgmr.msra.gmra.mrb[22].mxu1 %vm1380_vm3, %v2761_v35 }
0x1976   :  { %v3620_v37 = vpop.f32.mrb[22].mxu1 }
0x1977   :  { %v2857_v40 = vadd.f32 %v3620_v37, %v3179_v36  ;;  %v2851_v42 = vpop.f32.mrb[23].mxu1 }
0x1978   :  { %v2852_v43 = vadd.f32 %v3179_v36, %v2851_v42 }
0x1979   :  { %v2861_v44 = vadd.f32 %v2857_v40, %v2649_v1 }
0x197a   :  { %v2860_v39 = vadd.f32 %v2852_v43, %v2648_v0 }
0x197b   :  { %v2869_v38 = vsel %vm76_vm0, %v2861_v44, 0.0 }
0x197c   :  { %2870 = vadd.xlane.f32.xlu1 %v2869_v38  ;;  %v2866_v45 = vsel %vm76_vm0, %v2860_v39, 0.0 }
0x197d   :  { %2867 = vadd.xlane.f32.xlu0 %v2866_v45 }
0x1a09   :  { %v2871_v47 = vpop.xlane.xlu1 %2870 }
0x1a0a   :  { %v2873_v48 = vmul.f32 0.03125, %v2871_v47  ;;  %v2868_v49 = vpop.xlane.xlu0 %2867 }
0x1a0b   :  { %v2872_v50 = vmul.f32 0.03125, %v2868_v49 }
0x1a0c   :  { %v2875_v51 = vsub.f32 %v2861_v44, %v2873_v48 }
0x1a0d   :  { %v2874_v52 = vsub.f32 %v2860_v39, %v2872_v50 }
0x1a0e   :  { %v2877_v53 = vmul.f32 %v2875_v51, %v2875_v51 }
0x1a0f   :  { %v2876_v46 = vmul.f32 %v2874_v52, %v2874_v52 }
0x1a10   :  { %v2881_v41 = vsel %vm76_vm0, %v2877_v53, 0.0 }
0x1a11   :  { %2882 = vadd.xlane.f32.xlu1 %v2881_v41  ;;  %v2878_v54 = vsel %vm76_vm0, %v2876_v46, 0.0 }
0x1a12   :  { %2879 = vadd.xlane.f32.xlu0 %v2878_v54 }
0x1a9e   :  { %v2883_v0 = vpop.xlane.xlu1 %2882 }
0x1a9f   :  { %v2885_v1 = vmul.f32 0.03125, %v2883_v0  ;;  %v2880_v4 = vpop.xlane.xlu0 %2879 }
0x1aa0   :  { %v2884_v5 = vmul.f32 0.03125, %v2880_v4 }
0x1aa1   :  { %v2887_v6 = vadd.f32 1e-12, %v2885_v1 }
0x1aa2   :  { %v2886_v7 = vadd.f32 1e-12, %v2884_v5 }
0x1aa3   :  { %3906 = vrsqrt.f32 %v2887_v6 }
0x1aa4   :  { %3908 = vrsqrt.f32 %v2886_v7 }
0x1aad   :  { %v3907_v8 = vpop.eup %3906 }
0x1aae   :  { %v3909_v9 = vpop.eup %3908  ;;  %v2891_v10 = vmul.f32 %v3907_v8, %v2875_v51 }
0x1aaf   :  { %v2890_v12 = vmul.f32 %v3909_v9, %v2874_v52 }
0x1ab0   :  { %v2899_v2 = vmul.f32 %v3184_v57, %v2891_v10 }
0x1ab1   :  { %v2898_v3 = vmul.f32 %v3184_v57, %v2890_v12 }
0x1ab2   :  { %v2907_v13 = vadd.f32 %v3185_v11, %v2899_v2 }
0x1ab3   :  { %v2906_v14 = vadd.f32 %v3185_v11, %v2898_v3 }
0x1ab4   :  { %v2915_v15 = vsel %vm76_vm0, %v2907_v13, -inf }
0x1ab5   :  { %v2908_v16 = vsel %vm76_vm0, %v2906_v14, -inf  ;;  %v2916_v17 = vrot.slane %v2915_v15, 4 }
0x1ab6   :  { %v2909_v18 = vrot.slane %v2908_v16, 4 }
0x1ab7   :  { %v2917_v19 = vmax.f32 %v2915_v15, %v2916_v17 }
0x1ab8   :  { %v2910_v20 = vmax.f32 %v2908_v16, %v2909_v18 }
0x1ab9   :  { %v2918_v21 = vrot.slane %v2917_v19, 2 }
0x1aba   :  { %v2911_v22 = vrot.slane %v2910_v20, 2 }
0x1abb   :  { %v2919_v23 = vmax.f32 %v2917_v19, %v2918_v21 }
0x1abc   :  { %v2912_v24 = vmax.f32 %v2910_v20, %v2911_v22 }
0x1abd   :  { %v2920_v25 = vrot.slane %v2919_v23, 1 }
0x1abe   :  { %v2913_v26 = vrot.slane %v2912_v24, 1 }
0x1abf   :  { %v2921_v27 = vmax.f32 %v2919_v23, %v2920_v25 }
0x1ac0   :  { %v2914_v28 = vmax.f32 %v2912_v24, %v2913_v26 }
0x1ac2   :  { %v2923_v29 = vsel %vm2922_vm5, %v2914_v28, %v2921_v27 }
0x1ac3   :  { %3630 = vmatmul.mubr.msk.f32.vlgmr.msra.gmra.mrb[28].mxu0 %vm76_vm0, %v2923_v29 }
0x1b96   :  { %v3004_v31 = vpop.f32.mrb[28].mxu0 }
0x1b97   :  { %v3005_v32 = vadd.f32 %v3186_v30, %v3004_v31  ;;  %v3631_v33 = vpop.f32.mrb[29].mxu0 }
0x1b99   :  { %3009 = vst.msk [vmem:[#allocation2] sm:$0x3] %vm3008_vm6, %v3005_v32 }
0x1b9a   :  { %3921 = shalt.err (!%p3918_p4)
}
0x1b9b   :  { %s3922_s9 = scalar_lea.hbm %s4606_s22, 32 }
0x1b9c   :  { %p3923_p5 = scmp.ne.s32.totalorder %s4606_s22, %s3922_s9  ;;  %p3926_p6 = scmp.lt.u32.totalorder %s3922_s9, %s4606_s22 }
0x1b9e   :  { %p3928_p7 = pnand %p3926_p6, %p3923_p5 }
0x1ba0   :  { %3931 = shalt.err (!%p3928_p7)
}
0x1ba1   :  { %3019 = dma.vmem_to_hbm [thread:$0]  %s3017_s13, 32, %s4606_s22, [#allocation3]  }
0x1ba2   :  { %3932 = dma.done.wait [#allocation3], 32  }
0x1ba3   :  { %3933 = vsyncadd [#allocation3], 4294967264 }
0x1ba4   :  { %3023 = vsyncpa [#allocation3], 1 }

</bundles_post_ra>
